<compile_context>
chip_gen: v7x
topology: tpu7x:2x2x1
jax: 0.10.0
libtpu: 0.0.40
codegen_flags: <defaults>
</compile_context>

<pallas_src>
import functools

import jax
import jax.numpy as jnp
from jax.experimental import pallas as pl
from jax.experimental.pallas import tpu as pltpu


# ----------------------------------------------------------------------------- helpers
def _layernorm(x, gamma, beta, eps=1e-5):
    mu = jnp.mean(x, axis=-1, keepdims=True)
    var = jnp.mean((x - mu) ** 2, axis=-1, keepdims=True)
    return (x - mu) * jax.lax.rsqrt(var + eps) * gamma + beta


def _seq_tile(n, target=256):
    """Largest divisor of n that is a multiple of 8 and <= target (or n itself)."""
    if n <= target:
        return n
    best = None
    for t in range(8, target + 1, 8):
        if n % t == 0:
            best = t
    return best if best is not None else n


def _f_tile(n, target=512):
    """Largest divisor of n that is a multiple of 128 and <= target (or n itself)."""
    if n <= target:
        return n
    best = None
    for t in range(128, target + 1, 128):
        if n % t == 0:
            best = t
    return best if best is not None else n


_VMEM_LIMIT = 48 * 1024 * 1024  # explicit scoped-VMEM budget, headroom under v7x's 64 MiB


def _cparams(sem):
    return pltpu.CompilerParams(dimension_semantics=sem, vmem_limit_bytes=_VMEM_LIMIT)


# ----------------------------------------------------------------------------- kernels
def qkv_proj_kernel(x_ref, w_in_ref, b_in_ref, qkv_ref):
    """Fused (D, 3D) input projection: one lane-dense bf16 MXU matmul per seq tile."""
    x = x_ref[0].astype(jnp.bfloat16)                       # (Ts, D)
    acc = jnp.dot(x, w_in_ref[...], preferred_element_type=jnp.float32)
    acc = acc + b_in_ref[...]                               # fp32 bias
    qkv_ref[0] = acc.astype(qkv_ref.dtype)                  # (Ts, 3D) bf16


def flash_attn_kernel(q_ref, k_ref, v_ref, o_ref, m_sc, l_sc, acc_sc, *, scale):
    """Online-softmax attention; heads are the leading batch dim of the einsums."""
    j = pl.program_id(2)

    @pl.when(j == 0)
    def _():
        m_sc[...] = jnp.full(m_sc.shape, -jnp.inf, dtype=m_sc.dtype)
        l_sc[...] = jnp.zeros(l_sc.shape, dtype=l_sc.dtype)
        acc_sc[...] = jnp.zeros(acc_sc.shape, dtype=acc_sc.dtype)

    q = q_ref[0]                                            # (H, Tq, dh) bf16
    k = k_ref[0]                                            # (H, Tk, dh) bf16
    v = v_ref[0]                                            # (H, Tk, dh) bf16

    s = jnp.einsum("hqd,hkd->hqk", q, k,
                   preferred_element_type=jnp.float32) * scale
    m_prev = m_sc[...]
    m_new = jnp.maximum(m_prev, jnp.max(s, axis=-1, keepdims=True))
    alpha = jnp.exp(m_prev - m_new)
    p = jnp.exp(s - m_new)                                  # fp32 softmax numerators
    l_sc[...] = alpha * l_sc[...] + jnp.sum(p, axis=-1, keepdims=True)
    acc_sc[...] = alpha * acc_sc[...] + jnp.einsum(
        "hqk,hkd->hqd", p.astype(v.dtype), v, preferred_element_type=jnp.float32)
    m_sc[...] = m_new

    @pl.when(j == pl.num_programs(2) - 1)
    def _():
        inv_l = pl.reciprocal(l_sc[...], approx=True)       # EUP slot, off the VPU path
        o_ref[0] = (acc_sc[...] * inv_l).astype(o_ref.dtype)


def ffn_block_kernel(ctx_ref, x_ref, wo_ref, bo_ref, g1_ref, be1_ref,
                     w1_ref, b1_ref, w2_ref, b2_ref, g2_ref, be2_ref,
                     o_ref, h1_sc, acc_sc):
    """Out-proj + residual + LN1, then FFN streamed over F tiles, residual + LN2."""
    f = pl.program_id(2)

    @pl.when(f == 0)
    def _():
        attn = jnp.dot(ctx_ref[0], wo_ref[...],
                       preferred_element_type=jnp.float32) + bo_ref[...]
        h1 = _layernorm(x_ref[0].astype(jnp.float32) + attn, g1_ref[...], be1_ref[...])
        h1_sc[...] = h1
        acc_sc[...] = jnp.zeros(acc_sc.shape, dtype=acc_sc.dtype)

    h1b = h1_sc[...].astype(jnp.bfloat16)
    t = jnp.dot(h1b, w1_ref[...], preferred_element_type=jnp.float32) + b1_ref[...]
    t = jnp.maximum(t, 0.0)                                 # ReLU (exact under F-tiling)
    acc_sc[...] += jnp.dot(t.astype(jnp.bfloat16), w2_ref[...],
                           preferred_element_type=jnp.float32)

    @pl.when(f == pl.num_programs(2) - 1)
    def _():
        out = _layernorm(h1_sc[...] + acc_sc[...] + b2_ref[...],
                         g2_ref[...], be2_ref[...])
        o_ref[0] = out.astype(o_ref.dtype)


# ----------------------------------------------------------------------------- wrapper
def transformer_encoder_layer(src, params, *, nhead: int):
    """src: (B, S, D) float32.  params: dict (bf16 matmul weights, fp32 biases/LN)."""
    B, S, D = src.shape
    assert D % nhead == 0
    dh = D // nhead
    F = params["w1"].shape[1]

    Ts = _seq_tile(S)            # query / row tile
    Tk = _seq_tile(S)            # kv tile
    Tf = _f_tile(F)              # FFN hidden-dim tile
    n_s, n_k, n_f = S // Ts, S // Tk, F // Tf

    # ---- stage 1: fused QKV projection -----------------------------------
    qkv = pl.pallas_call(
        qkv_proj_kernel,
        out_shape=jax.ShapeDtypeStruct((B, S, 3 * D), jnp.bfloat16),
        grid_spec=pltpu.PrefetchScalarGridSpec(
            num_scalar_prefetch=0,
            grid=(B, n_s),
            in_specs=[
                pl.BlockSpec((1, Ts, D), lambda b, i: (b, i, 0)),
                pl.BlockSpec((D, 3 * D), lambda b, i: (0, 0)),
                pl.BlockSpec((1, 3 * D), lambda b, i: (0, 0)),
            ],
            out_specs=pl.BlockSpec((1, Ts, 3 * D), lambda b, i: (b, i, 0)),
        ),
        compiler_params=_cparams(("parallel", "parallel")),
    )(src, params["w_in"], params["b_in"])

    # head split = wrapper-side layout plumbing only (no in-kernel lane slicing/concat)
    q, k, v = qkv[..., :D], qkv[..., D:2 * D], qkv[..., 2 * D:]
    to_heads = lambda t: t.reshape(B, S, nhead, dh).transpose(0, 2, 1, 3)
    qh, kh, vh = to_heads(q), to_heads(k), to_heads(v)      # (B, H, S, dh) bf16

    # ---- stage 2: flash attention -----------------------------------------
    scale = 1.0 / (dh ** 0.5)
    ctx = pl.pallas_call(
        functools.partial(flash_attn_kernel, scale=scale),
        out_shape=jax.ShapeDtypeStruct((B, nhead, S, dh), jnp.bfloat16),
        grid_spec=pltpu.PrefetchScalarGridSpec(
            num_scalar_prefetch=0,
            grid=(B, n_s, n_k),
            in_specs=[
                pl.BlockSpec((1, nhead, Ts, dh), lambda b, i, j: (b, 0, i, 0)),
                pl.BlockSpec((1, nhead, Tk, dh), lambda b, i, j: (b, 0, j, 0)),
                pl.BlockSpec((1, nhead, Tk, dh), lambda b, i, j: (b, 0, j, 0)),
            ],
            out_specs=pl.BlockSpec((1, nhead, Ts, dh), lambda b, i, j: (b, 0, i, 0)),
            scratch_shapes=[
                pltpu.VMEM((nhead, Ts, 1), jnp.float32),    # running max
                pltpu.VMEM((nhead, Ts, 1), jnp.float32),    # running denom
                pltpu.VMEM((nhead, Ts, dh), jnp.float32),   # output accumulator
            ],
        ),
        compiler_params=_cparams(("parallel", "parallel", "arbitrary")),
    )(qh, kh, vh)

    # head merge back to lane-dense (B, S, D) — wrapper layout plumbing
    ctx2d = ctx.transpose(0, 2, 1, 3).reshape(B, S, D)

    # ---- stage 3: out-proj + LN1 + FFN (F-streamed) + LN2 ------------------
    out = pl.pallas_call(
        ffn_block_kernel,
        out_shape=jax.ShapeDtypeStruct((B, S, D), src.dtype),
        grid_spec=pltpu.PrefetchScalarGridSpec(
            num_scalar_prefetch=0,
            grid=(B, n_s, n_f),
            in_specs=[
                pl.BlockSpec((1, Ts, D), lambda b, i, f: (b, i, 0)),   # attn context
                pl.BlockSpec((1, Ts, D), lambda b, i, f: (b, i, 0)),   # src (residual)
                pl.BlockSpec((D, D), lambda b, i, f: (0, 0)),          # wo
                pl.BlockSpec((1, D), lambda b, i, f: (0, 0)),          # bo
                pl.BlockSpec((1, D), lambda b, i, f: (0, 0)),          # norm1 gamma
                pl.BlockSpec((1, D), lambda b, i, f: (0, 0)),          # norm1 beta
                pl.BlockSpec((D, Tf), lambda b, i, f: (0, f)),         # w1 (F-tiled)
                pl.BlockSpec((1, Tf), lambda b, i, f: (0, f)),         # b1 (F-tiled)
                pl.BlockSpec((Tf, D), lambda b, i, f: (f, 0)),         # w2 (F-tiled)
                pl.BlockSpec((1, D), lambda b, i, f: (0, 0)),          # b2
                pl.BlockSpec((1, D), lambda b, i, f: (0, 0)),          # norm2 gamma
                pl.BlockSpec((1, D), lambda b, i, f: (0, 0)),          # norm2 beta
            ],
            out_specs=pl.BlockSpec((1, Ts, D), lambda b, i, f: (b, i, 0)),
            scratch_shapes=[
                pltpu.VMEM((Ts, D), jnp.float32),           # h1 (post-LN1)
                pltpu.VMEM((Ts, D), jnp.float32),           # FFN accumulator
            ],
        ),
        compiler_params=_cparams(("parallel", "parallel", "arbitrary")),
    )(ctx2d, src, params["wo"], params["bo"], params["g1"], params["be1"],
      params["w1"], params["b1"], params["w2"], params["b2"],
      params["g2"], params["be2"])

    return out


# ----------------------------------------------------------------------------- params
def init_params(key, d_model, dim_feedforward):
    """Synthetic params.  Matmul weights stored transposed (x @ W) and in bf16
    (MXU operands); biases / LayerNorm affine stay fp32."""
    ks = jax.random.split(key, 8)
    s = 0.1
    D, F = d_model, dim_feedforward
    bf = lambda a: a.astype(jnp.bfloat16)
    return {
        # fused in_proj: columns [Wq | Wk | Wv]
        "w_in": bf(jax.random.normal(ks[0], (D, 3 * D), jnp.float32) * s),
        "b_in": jax.random.normal(ks[1], (1, 3 * D), jnp.float32) * s,
        "wo": bf(jax.random.normal(ks[2], (D, D), jnp.float32) * s),
        "bo": jax.random.normal(ks[3], (1, D), jnp.float32) * s,
        "g1": jnp.ones((1, D), jnp.float32),
        "be1": jnp.zeros((1, D), jnp.float32),
        "w1": bf(jax.random.normal(ks[4], (D, F), jnp.float32) * s),
        "b1": jax.random.normal(ks[5], (1, F), jnp.float32) * s,
        "w2": bf(jax.random.normal(ks[6], (F, D), jnp.float32) * s),
        "b2": jax.random.normal(ks[7], (1, D), jnp.float32) * s,
        "g2": jnp.ones((1, D), jnp.float32),
        "be2": jnp.zeros((1, D), jnp.float32),
    }


# ----------------------------------------------------------------------------- reference
def reference_jax(src, p, nhead):
    """Plain-JAX fp32 reference (mirrors PyTorch eval-mode forward)."""
    B, S, D = src.shape
    dh = D // nhead
    f32 = lambda a: a.astype(jnp.float32)
    qkv = src @ f32(p["w_in"]) + p["b_in"]
    q, k, v = qkv[..., :D], qkv[..., D:2 * D], qkv[..., 2 * D:]
    q = q.reshape(B, S, nhead, dh).transpose(0, 2, 1, 3)
    k = k.reshape(B, S, nhead, dh).transpose(0, 2, 1, 3)
    v = v.reshape(B, S, nhead, dh).transpose(0, 2, 1, 3)
    s = jnp.einsum("bhqd,bhkd->bhqk", q, k) / jnp.sqrt(dh)
    a = jax.nn.softmax(s, axis=-1)
    o = jnp.einsum("bhqk,bhkd->bhqd", a, v).transpose(0, 2, 1, 3).reshape(B, S, D)
    o = o @ f32(p["wo"]) + p["bo"]

    def ln(x, g, b):
        mu = x.mean(-1, keepdims=True)
        var = ((x - mu) ** 2).mean(-1, keepdims=True)
        return (x - mu) * jax.lax.rsqrt(var + 1e-5) * g + b

    h1 = ln(src + o, p["g1"], p["be1"])
    ff = jnp.maximum(h1 @ f32(p["w1"]) + p["b1"], 0.0) @ f32(p["w2"]) + p["b2"]
    return ln(h1 + ff, p["g2"], p["be2"])


if __name__ == "__main__":
    B, S, D, H, F = 2, 8, 32, 4, 64
    key = jax.random.PRNGKey(0)
    k_x, k_p = jax.random.split(key)
    src = jax.random.normal(k_x, (B, S, D), jnp.float32)
    params = init_params(k_p, D, F)

    fwd = jax.jit(functools.partial(transformer_encoder_layer, nhead=H))
    out = jax.block_until_ready(fwd(src, params))

    ref = reference_jax(src, params, H)
    assert out.shape == (B, S, D)
    err = float(jnp.max(jnp.abs(out - ref)))
    # bf16 MXU operands (fp32 accumulation) dominate the tolerance.
    assert err < 5e-2, f"mismatch vs JAX reference: {err}"
    print("KERNEL_OK")
</pallas_src>

<mosaic_0001>
module attributes {stable_mosaic.version = 11 : i64} {
  func.func @qkv_proj_kernel(%arg0: i32, %arg1: i32, %arg2: memref<1x8x32xf32, #tpu.memory_space<vmem>>, %arg3: memref<32x96xbf16, #tpu.memory_space<vmem>>, %arg4: memref<1x96xf32, #tpu.memory_space<vmem>>, %arg5: memref<1x8x96xbf16, #tpu.memory_space<vmem>>) attributes {dimension_semantics = [#tpu.dimension_semantics<parallel>, #tpu.dimension_semantics<parallel>], iteration_bounds = array<i64: 2, 1>, scalar_prefetch = 0 : i64, scratch_operands = 0 : i64, tpu.core_type = #tpu.core_type<tc>, window_params = [{transform_indices = @transform_0, window_bounds = array<i64: 1, 8, 32>}, {pipeline_mode = #tpu.pipeline_mode<synchronous>, transform_indices = @transform_1, window_bounds = array<i64: 32, 96>}, {pipeline_mode = #tpu.pipeline_mode<synchronous>, transform_indices = @transform_2, window_bounds = array<i64: 1, 96>}, {transform_indices = @transform_3, window_bounds = array<i64: 1, 8, 96>}]} {
    %c0 = arith.constant 0 : index
    %c0_0 = arith.constant 0 : index
    %c0_1 = arith.constant 0 : index
    %0 = vector.load %arg2[%c0, %c0_0, %c0_1] : memref<1x8x32xf32, #tpu.memory_space<vmem>>, vector<1x8x32xf32>
    %1 = vector.shape_cast %0 : vector<1x8x32xf32> to vector<8x32xf32>
    %2 = arith.truncf %1 : vector<8x32xf32> to vector<8x32xbf16>
    %c0_2 = arith.constant 0 : index
    %c0_3 = arith.constant 0 : index
    %3 = vector.load %arg3[%c0_2, %c0_3] : memref<32x96xbf16, #tpu.memory_space<vmem>>, vector<32x96xbf16>
    %cst = arith.constant dense<0.000000e+00> : vector<8x96xf32>
    %4 = tpu.matmul %2, %3, %cst {dimension_numbers = #tpu.dot_dimension_numbers<[1], [0], [0], [1], [0, 0, 1, 1], [], []>} : vector<8x32xbf16>, vector<32x96xbf16>, vector<8x96xf32> -> vector<8x96xf32>
    %c0_4 = arith.constant 0 : index
    %c0_5 = arith.constant 0 : index
    %5 = vector.load %arg4[%c0_4, %c0_5] : memref<1x96xf32, #tpu.memory_space<vmem>>, vector<1x96xf32>
    %6 = vector.broadcast %5 : vector<1x96xf32> to vector<8x96xf32>
    %7 = arith.addf %4, %6 : vector<8x96xf32>
    %8 = arith.truncf %7 : vector<8x96xf32> to vector<8x96xbf16>
    %c0_6 = arith.constant 0 : index
    %c0_7 = arith.constant 0 : index
    %c0_8 = arith.constant 0 : index
    %9 = vector.load %arg5[%c0_6, %c0_7, %c0_8] : memref<1x8x96xbf16, #tpu.memory_space<vmem>>, vector<1x8x96xbf16>
    %10 = vector.shape_cast %9 : vector<1x8x96xbf16> to vector<8x96xbf16>
    %11 = vector.shape_cast %8 : vector<8x96xbf16> to vector<1x8x96xbf16>
    tpu.vector_store %arg5[%c0_6, %c0_7, %c0_8], %11 {strides = array<i32>} : memref<1x8x96xbf16, #tpu.memory_space<vmem>>, vector<1x8x96xbf16>,
    return
  }
  func.func @transform_0(%arg0: i32, %arg1: i32) -> (i32, i32, i32) {
    %c0_i32 = arith.constant 0 : i32
    %c0_i32_0 = arith.constant 0 : i32
    return %arg0, %arg1, %c0_i32 : i32, i32, i32
  }
  func.func @transform_1(%arg0: i32, %arg1: i32) -> (i32, i32) {
    %c0_i32 = arith.constant 0 : i32
    %c0_i32_0 = arith.constant 0 : i32
    %c0_i32_1 = arith.constant 0 : i32
    return %c0_i32, %c0_i32_0 : i32, i32
  }
  func.func @transform_2(%arg0: i32, %arg1: i32) -> (i32, i32) {
    %c0_i32 = arith.constant 0 : i32
    %c0_i32_0 = arith.constant 0 : i32
    %c0_i32_1 = arith.constant 0 : i32
    return %c0_i32, %c0_i32_0 : i32, i32
  }
  func.func @transform_3(%arg0: i32, %arg1: i32) -> (i32, i32, i32) {
    %c0_i32 = arith.constant 0 : i32
    %c0_i32_0 = arith.constant 0 : i32
    return %arg0, %arg1, %c0_i32 : i32, i32, i32
  }
}

module attributes {stable_mosaic.version = 11 : i64} {
  func.func @flash_attn_kernel(%arg0: i32, %arg1: i32, %arg2: i32, %arg3: memref<1x4x8x8xbf16, #tpu.memory_space<vmem>>, %arg4: memref<1x4x8x8xbf16, #tpu.memory_space<vmem>>, %arg5: memref<1x4x8x8xbf16, #tpu.memory_space<vmem>>, %arg6: memref<1x4x8x8xbf16, #tpu.memory_space<vmem>>, %arg7: memref<4x8x1xf32, #tpu.memory_space<vmem>>, %arg8: memref<4x8x1xf32, #tpu.memory_space<vmem>>, %arg9: memref<4x8x8xf32, #tpu.memory_space<vmem>>) attributes {dimension_semantics = [#tpu.dimension_semantics<parallel>, #tpu.dimension_semantics<parallel>, #tpu.dimension_semantics<arbitrary>], iteration_bounds = array<i64: 2, 1, 1>, scalar_prefetch = 0 : i64, scratch_operands = 3 : i64, tpu.core_type = #tpu.core_type<tc>, window_params = [{transform_indices = @transform_0, window_bounds = array<i64: 1, 4, 8, 8>}, {transform_indices = @transform_1, window_bounds = array<i64: 1, 4, 8, 8>}, {transform_indices = @transform_2, window_bounds = array<i64: 1, 4, 8, 8>}, {transform_indices = @transform_3, window_bounds = array<i64: 1, 4, 8, 8>}]} {
    %c0_i32 = arith.constant 0 : i32
    %0 = arith.cmpi eq, %arg2, %c0_i32 : i32
    %1 = arith.extui %0 : i1 to i32
    %c0_i32_0 = arith.constant 0 : i32
    %2 = arith.cmpi ne, %1, %c0_i32_0 : i32
    scf.if %2 {
      %cst_36 = arith.constant 0xFF800000 : f32
      %38 = vector.broadcast %cst_36 : f32 to vector<4x8x1xf32>
      %c0_37 = arith.constant 0 : index
      %c0_38 = arith.constant 0 : index
      %c0_39 = arith.constant 0 : index
      %39 = vector.load %arg7[%c0_37, %c0_38, %c0_39] : memref<4x8x1xf32, #tpu.memory_space<vmem>>, vector<4x8x1xf32>
      tpu.vector_store %arg7[%c0_37, %c0_38, %c0_39], %38 {strides = array<i32>} : memref<4x8x1xf32, #tpu.memory_space<vmem>>, vector<4x8x1xf32>,
      %cst_40 = arith.constant 0.000000e+00 : f32
      %40 = vector.broadcast %cst_40 : f32 to vector<4x8x1xf32>
      %c0_41 = arith.constant 0 : index
      %c0_42 = arith.constant 0 : index
      %c0_43 = arith.constant 0 : index
      %41 = vector.load %arg8[%c0_41, %c0_42, %c0_43] : memref<4x8x1xf32, #tpu.memory_space<vmem>>, vector<4x8x1xf32>
      tpu.vector_store %arg8[%c0_41, %c0_42, %c0_43], %40 {strides = array<i32>} : memref<4x8x1xf32, #tpu.memory_space<vmem>>, vector<4x8x1xf32>,
      %cst_44 = arith.constant 0.000000e+00 : f32
      %42 = vector.broadcast %cst_44 : f32 to vector<4x8x8xf32>
      %c0_45 = arith.constant 0 : index
      %c0_46 = arith.constant 0 : index
      %c0_47 = arith.constant 0 : index
      %43 = vector.load %arg9[%c0_45, %c0_46, %c0_47] : memref<4x8x8xf32, #tpu.memory_space<vmem>>, vector<4x8x8xf32>
      tpu.vector_store %arg9[%c0_45, %c0_46, %c0_47], %42 {strides = array<i32>} : memref<4x8x8xf32, #tpu.memory_space<vmem>>, vector<4x8x8xf32>,
    } else {
    }
    %c0 = arith.constant 0 : index
    %c0_1 = arith.constant 0 : index
    %c0_2 = arith.constant 0 : index
    %c0_3 = arith.constant 0 : index
    %3 = vector.load %arg3[%c0, %c0_1, %c0_2, %c0_3] : memref<1x4x8x8xbf16, #tpu.memory_space<vmem>>, vector<1x4x8x8xbf16>
    %4 = vector.shape_cast %3 : vector<1x4x8x8xbf16> to vector<4x8x8xbf16>
    %c0_4 = arith.constant 0 : index
    %c0_5 = arith.constant 0 : index
    %c0_6 = arith.constant 0 : index
    %c0_7 = arith.constant 0 : index
    %5 = vector.load %arg4[%c0_4, %c0_5, %c0_6, %c0_7] : memref<1x4x8x8xbf16, #tpu.memory_space<vmem>>, vector<1x4x8x8xbf16>
    %6 = vector.shape_cast %5 : vector<1x4x8x8xbf16> to vector<4x8x8xbf16>
    %c0_8 = arith.constant 0 : index
    %c0_9 = arith.constant 0 : index
    %c0_10 = arith.constant 0 : index
    %c0_11 = arith.constant 0 : index
    %7 = vector.load %arg5[%c0_8, %c0_9, %c0_10, %c0_11] : memref<1x4x8x8xbf16, #tpu.memory_space<vmem>>, vector<1x4x8x8xbf16>
    %8 = vector.shape_cast %7 : vector<1x4x8x8xbf16> to vector<4x8x8xbf16>
    "tpu.trace_start"() <{level = 10 : i32, message = "hqd,hkd->hqk"}> : () -> ()
    %cst = arith.constant dense<0.000000e+00> : vector<4x8x8xf32>
    %9 = tpu.matmul %4, %6, %cst {dimension_numbers = #tpu.dot_dimension_numbers<[2], [2], [1], [1], [0, 0, 0, 1, 1, 1], [0], [0]>} : vector<4x8x8xbf16>, vector<4x8x8xbf16>, vector<4x8x8xf32> -> vector<4x8x8xf32>
    "tpu.trace_stop"() : () -> ()
    %cst_12 = arith.constant 0.353553385 : f32
    %10 = vector.broadcast %cst_12 : f32 to vector<4x8x8xf32>
    %11 = arith.mulf %9, %10 : vector<4x8x8xf32>
    %c0_13 = arith.constant 0 : index
    %c0_14 = arith.constant 0 : index
    %c0_15 = arith.constant 0 : index
    %12 = vector.load %arg7[%c0_13, %c0_14, %c0_15] : memref<4x8x1xf32, #tpu.memory_space<vmem>>, vector<4x8x1xf32>
    %cst_16 = arith.constant dense<0xFF800000> : vector<4x8xf32>
    %13 = vector.multi_reduction <maximumf>, %11, %cst_16 [2] : vector<4x8x8xf32> to vector<4x8xf32>
    %14 = vector.shape_cast %13 : vector<4x8xf32> to vector<4x8x1xf32>
    %15 = arith.maximumf %12, %14 : vector<4x8x1xf32>
    %16 = arith.subf %12, %15 : vector<4x8x1xf32>
    %17 = math.exp %16 : vector<4x8x1xf32>
    %18 = vector.broadcast %15 : vector<4x8x1xf32> to vector<4x8x8xf32>
    %19 = arith.subf %11, %18 : vector<4x8x8xf32>
    %20 = math.exp %19 : vector<4x8x8xf32>
    %c0_17 = arith.constant 0 : index
    %c0_18 = arith.constant 0 : index
    %c0_19 = arith.constant 0 : index
    %21 = vector.load %arg8[%c0_17, %c0_18, %c0_19] : memref<4x8x1xf32, #tpu.memory_space<vmem>>, vector<4x8x1xf32>
    %22 = arith.mulf %17, %21 : vector<4x8x1xf32>
    %cst_20 = arith.constant dense<0.000000e+00> : vector<4x8xf32>
    %23 = vector.multi_reduction <add>, %20, %cst_20 [2] : vector<4x8x8xf32> to vector<4x8xf32>
    %24 = vector.shape_cast %23 : vector<4x8xf32> to vector<4x8x1xf32>
    %25 = arith.addf %22, %24 : vector<4x8x1xf32>
    %c0_21 = arith.constant 0 : index
    %c0_22 = arith.constant 0 : index
    %c0_23 = arith.constant 0 : index
    %26 = vector.load %arg8[%c0_21, %c0_22, %c0_23] : memref<4x8x1xf32, #tpu.memory_space<vmem>>, vector<4x8x1xf32>
    tpu.vector_store %arg8[%c0_21, %c0_22, %c0_23], %25 {strides = array<i32>} : memref<4x8x1xf32, #tpu.memory_space<vmem>>, vector<4x8x1xf32>,
    %c0_24 = arith.constant 0 : index
    %c0_25 = arith.constant 0 : index
    %c0_26 = arith.constant 0 : index
    %27 = vector.load %arg9[%c0_24, %c0_25, %c0_26] : memref<4x8x8xf32, #tpu.memory_space<vmem>>, vector<4x8x8xf32>
    %28 = vector.broadcast %17 : vector<4x8x1xf32> to vector<4x8x8xf32>
    %29 = arith.mulf %28, %27 : vector<4x8x8xf32>
    %30 = arith.truncf %20 : vector<4x8x8xf32> to vector<4x8x8xbf16>
    "tpu.trace_start"() <{level = 10 : i32, message = "hqk,hkd->hqd"}> : () -> ()
    %cst_27 = arith.constant dense<0.000000e+00> : vector<4x8x8xf32>
    %31 = tpu.matmul %30, %8, %cst_27 {dimension_numbers = #tpu.dot_dimension_numbers<[2], [1], [1], [2], [0, 0, 0, 1, 1, 2], [0], [0]>} : vector<4x8x8xbf16>, vector<4x8x8xbf16>, vector<4x8x8xf32> -> vector<4x8x8xf32>
    "tpu.trace_stop"() : () -> ()
    %32 = arith.addf %29, %31 : vector<4x8x8xf32>
    %c0_28 = arith.constant 0 : index
    %c0_29 = arith.constant 0 : index
    %c0_30 = arith.constant 0 : index
    %33 = vector.load %arg9[%c0_28, %c0_29, %c0_30] : memref<4x8x8xf32, #tpu.memory_space<vmem>>, vector<4x8x8xf32>
    tpu.vector_store %arg9[%c0_28, %c0_29, %c0_30], %32 {strides = array<i32>} : memref<4x8x8xf32, #tpu.memory_space<vmem>>, vector<4x8x8xf32>,
    %c0_31 = arith.constant 0 : index
    %c0_32 = arith.constant 0 : index
    %c0_33 = arith.constant 0 : index
    %34 = vector.load %arg7[%c0_31, %c0_32, %c0_33] : memref<4x8x1xf32, #tpu.memory_space<vmem>>, vector<4x8x1xf32>
    tpu.vector_store %arg7[%c0_31, %c0_32, %c0_33], %15 {strides = array<i32>} : memref<4x8x1xf32, #tpu.memory_space<vmem>>, vector<4x8x1xf32>,
    %c0_i32_34 = arith.constant 0 : i32
    %35 = arith.cmpi eq, %arg2, %c0_i32_34 : i32
    %36 = arith.extui %35 : i1 to i32
    %c0_i32_35 = arith.constant 0 : i32
    %37 = arith.cmpi ne, %36, %c0_i32_35 : i32
    scf.if %37 {
      %c0_36 = arith.constant 0 : index
      %c0_37 = arith.constant 0 : index
      %c0_38 = arith.constant 0 : index
      %38 = vector.load %arg8[%c0_36, %c0_37, %c0_38] : memref<4x8x1xf32, #tpu.memory_space<vmem>>, vector<4x8x1xf32>
      %39 = tpu.reciprocal %38 {approx = true} : vector<4x8x1xf32> -> vector<4x8x1xf32>
      %c0_39 = arith.constant 0 : index
      %c0_40 = arith.constant 0 : index
      %c0_41 = arith.constant 0 : index
      %40 = vector.load %arg9[%c0_39, %c0_40, %c0_41] : memref<4x8x8xf32, #tpu.memory_space<vmem>>, vector<4x8x8xf32>
      %41 = vector.broadcast %39 : vector<4x8x1xf32> to vector<4x8x8xf32>
      %42 = arith.mulf %40, %41 : vector<4x8x8xf32>
      %43 = arith.truncf %42 : vector<4x8x8xf32> to vector<4x8x8xbf16>
      %c0_42 = arith.constant 0 : index
      %c0_43 = arith.constant 0 : index
      %c0_44 = arith.constant 0 : index
      %c0_45 = arith.constant 0 : index
      %44 = vector.load %arg6[%c0_42, %c0_43, %c0_44, %c0_45] : memref<1x4x8x8xbf16, #tpu.memory_space<vmem>>, vector<1x4x8x8xbf16>
      %45 = vector.shape_cast %44 : vector<1x4x8x8xbf16> to vector<4x8x8xbf16>
      %46 = vector.shape_cast %43 : vector<4x8x8xbf16> to vector<1x4x8x8xbf16>
      tpu.vector_store %arg6[%c0_42, %c0_43, %c0_44, %c0_45], %46 {strides = array<i32>} : memref<1x4x8x8xbf16, #tpu.memory_space<vmem>>, vector<1x4x8x8xbf16>,
    } else {
    }
    return
  }
  func.func @transform_0(%arg0: i32, %arg1: i32, %arg2: i32) -> (i32, i32, i32, i32) {
    %c0_i32 = arith.constant 0 : i32
    %c0_i32_0 = arith.constant 0 : i32
    %c0_i32_1 = arith.constant 0 : i32
    return %arg0, %c0_i32, %arg1, %c0_i32_0 : i32, i32, i32, i32
  }
  func.func @transform_1(%arg0: i32, %arg1: i32, %arg2: i32) -> (i32, i32, i32, i32) {
    %c0_i32 = arith.constant 0 : i32
    %c0_i32_0 = arith.constant 0 : i32
    %c0_i32_1 = arith.constant 0 : i32
    return %arg0, %c0_i32, %arg2, %c0_i32_0 : i32, i32, i32, i32
  }
  func.func @transform_2(%arg0: i32, %arg1: i32, %arg2: i32) -> (i32, i32, i32, i32) {
    %c0_i32 = arith.constant 0 : i32
    %c0_i32_0 = arith.constant 0 : i32
    %c0_i32_1 = arith.constant 0 : i32
    return %arg0, %c0_i32, %arg2, %c0_i32_0 : i32, i32, i32, i32
  }
  func.func @transform_3(%arg0: i32, %arg1: i32, %arg2: i32) -> (i32, i32, i32, i32) {
    %c0_i32 = arith.constant 0 : i32
    %c0_i32_0 = arith.constant 0 : i32
    %c0_i32_1 = arith.constant 0 : i32
    return %arg0, %c0_i32, %arg1, %c0_i32_0 : i32, i32, i32, i32
  }
}

module attributes {stable_mosaic.version = 11 : i64} {
  func.func @ffn_block_kernel(%arg0: i32, %arg1: i32, %arg2: i32, %arg3: memref<1x8x32xbf16, #tpu.memory_space<vmem>>, %arg4: memref<1x8x32xf32, #tpu.memory_space<vmem>>, %arg5: memref<32x32xbf16, #tpu.memory_space<vmem>>, %arg6: memref<1x32xf32, #tpu.memory_space<vmem>>, %arg7: memref<1x32xf32, #tpu.memory_space<vmem>>, %arg8: memref<1x32xf32, #tpu.memory_space<vmem>>, %arg9: memref<32x64xbf16, #tpu.memory_space<vmem>>, %arg10: memref<1x64xf32, #tpu.memory_space<vmem>>, %arg11: memref<64x32xbf16, #tpu.memory_space<vmem>>, %arg12: memref<1x32xf32, #tpu.memory_space<vmem>>, %arg13: memref<1x32xf32, #tpu.memory_space<vmem>>, %arg14: memref<1x32xf32, #tpu.memory_space<vmem>>, %arg15: memref<1x8x32xf32, #tpu.memory_space<vmem>>, %arg16: memref<8x32xf32, #tpu.memory_space<vmem>>, %arg17: memref<8x32xf32, #tpu.memory_space<vmem>>) attributes {dimension_semantics = [#tpu.dimension_semantics<parallel>, #tpu.dimension_semantics<parallel>, #tpu.dimension_semantics<arbitrary>], iteration_bounds = array<i64: 2, 1, 1>, scalar_prefetch = 0 : i64, scratch_operands = 2 : i64, tpu.core_type = #tpu.core_type<tc>, window_params = [{transform_indices = @transform_0, window_bounds = array<i64: 1, 8, 32>}, {transform_indices = @transform_1, window_bounds = array<i64: 1, 8, 32>}, {pipeline_mode = #tpu.pipeline_mode<synchronous>, transform_indices = @transform_2, window_bounds = array<i64: 32, 32>}, {pipeline_mode = #tpu.pipeline_mode<synchronous>, transform_indices = @transform_3, window_bounds = array<i64: 1, 32>}, {pipeline_mode = #tpu.pipeline_mode<synchronous>, transform_indices = @transform_4, window_bounds = array<i64: 1, 32>}, {pipeline_mode = #tpu.pipeline_mode<synchronous>, transform_indices = @transform_5, window_bounds = array<i64: 1, 32>}, {transform_indices = @transform_6, window_bounds = array<i64: 32, 64>}, {transform_indices = @transform_7, window_bounds = array<i64: 1, 64>}, {transform_indices = @transform_8, window_bounds = array<i64: 64, 32>}, {pipeline_mode = #tpu.pipeline_mode<synchronous>, transform_indices = @transform_9, window_bounds = array<i64: 1, 32>}, {pipeline_mode = #tpu.pipeline_mode<synchronous>, transform_indices = @transform_10, window_bounds = array<i64: 1, 32>}, {pipeline_mode = #tpu.pipeline_mode<synchronous>, transform_indices = @transform_11, window_bounds = array<i64: 1, 32>}, {transform_indices = @transform_12, window_bounds = array<i64: 1, 8, 32>}]} {
    %c0_i32 = arith.constant 0 : i32
    %0 = arith.cmpi eq, %arg2, %c0_i32 : i32
    %1 = arith.extui %0 : i1 to i32
    %c0_i32_0 = arith.constant 0 : i32
    %2 = arith.cmpi ne, %1, %c0_i32_0 : i32
    scf.if %2 {
      %c0_16 = arith.constant 0 : index
      %c0_17 = arith.constant 0 : index
      %c0_18 = arith.constant 0 : index
      %21 = vector.load %arg3[%c0_16, %c0_17, %c0_18] : memref<1x8x32xbf16, #tpu.memory_space<vmem>>, vector<1x8x32xbf16>
      %22 = vector.shape_cast %21 : vector<1x8x32xbf16> to vector<8x32xbf16>
      %c0_19 = arith.constant 0 : index
      %c0_20 = arith.constant 0 : index
      %23 = vector.load %arg5[%c0_19, %c0_20] : memref<32x32xbf16, #tpu.memory_space<vmem>>, vector<32x32xbf16>
      %cst_21 = arith.constant dense<0.000000e+00> : vector<8x32xf32>
      %24 = tpu.matmul %22, %23, %cst_21 {dimension_numbers = #tpu.dot_dimension_numbers<[1], [0], [0], [1], [0, 0, 1, 1], [], []>} : vector<8x32xbf16>, vector<32x32xbf16>, vector<8x32xf32> -> vector<8x32xf32>
      %c0_22 = arith.constant 0 : index
      %c0_23 = arith.constant 0 : index
      %25 = vector.load %arg6[%c0_22, %c0_23] : memref<1x32xf32, #tpu.memory_space<vmem>>, vector<1x32xf32>
      %26 = vector.broadcast %25 : vector<1x32xf32> to vector<8x32xf32>
      %27 = arith.addf %24, %26 : vector<8x32xf32>
      %c0_24 = arith.constant 0 : index
      %c0_25 = arith.constant 0 : index
      %c0_26 = arith.constant 0 : index
      %28 = vector.load %arg4[%c0_24, %c0_25, %c0_26] : memref<1x8x32xf32, #tpu.memory_space<vmem>>, vector<1x8x32xf32>
      %29 = vector.shape_cast %28 : vector<1x8x32xf32> to vector<8x32xf32>
      %30 = arith.addf %29, %27 : vector<8x32xf32>
      %c0_27 = arith.constant 0 : index
      %c0_28 = arith.constant 0 : index
      %31 = vector.load %arg7[%c0_27, %c0_28] : memref<1x32xf32, #tpu.memory_space<vmem>>, vector<1x32xf32>
      %c0_29 = arith.constant 0 : index
      %c0_30 = arith.constant 0 : index
      %32 = vector.load %arg8[%c0_29, %c0_30] : memref<1x32xf32, #tpu.memory_space<vmem>>, vector<1x32xf32>
      %cst_31 = arith.constant dense<0.000000e+00> : vector<8xf32>
      %33 = vector.multi_reduction <add>, %30, %cst_31 [1] : vector<8x32xf32> to vector<8xf32>
      %34 = vector.shape_cast %33 : vector<8xf32> to vector<8x1xf32>
      %cst_32 = arith.constant 3.200000e+01 : f32
      %35 = vector.broadcast %cst_32 : f32 to vector<8x1xf32>
      %36 = arith.divf %34, %35 : vector<8x1xf32>
      %37 = vector.broadcast %36 : vector<8x1xf32> to vector<8x32xf32>
      %38 = arith.subf %30, %37 : vector<8x32xf32>
      %39 = arith.mulf %38, %38 : vector<8x32xf32>
      %cst_33 = arith.constant dense<0.000000e+00> : vector<8xf32>
      %40 = vector.multi_reduction <add>, %39, %cst_33 [1] : vector<8x32xf32> to vector<8xf32>
      %41 = vector.shape_cast %40 : vector<8xf32> to vector<8x1xf32>
      %cst_34 = arith.constant 3.200000e+01 : f32
      %42 = vector.broadcast %cst_34 : f32 to vector<8x1xf32>
      %43 = arith.divf %41, %42 : vector<8x1xf32>
      %44 = vector.broadcast %36 : vector<8x1xf32> to vector<8x32xf32>
      %45 = arith.subf %30, %44 : vector<8x32xf32>
      %cst_35 = arith.constant 9.99999974E-6 : f32
      %46 = vector.broadcast %cst_35 : f32 to vector<8x1xf32>
      %47 = arith.addf %43, %46 : vector<8x1xf32>
      %48 = math.rsqrt %47 : vector<8x1xf32>
      %49 = vector.broadcast %48 : vector<8x1xf32> to vector<8x32xf32>
      %50 = arith.mulf %45, %49 : vector<8x32xf32>
      %51 = vector.broadcast %31 : vector<1x32xf32> to vector<8x32xf32>
      %52 = arith.mulf %50, %51 : vector<8x32xf32>
      %53 = vector.broadcast %32 : vector<1x32xf32> to vector<8x32xf32>
      %54 = arith.addf %52, %53 : vector<8x32xf32>
      %c0_36 = arith.constant 0 : index
      %c0_37 = arith.constant 0 : index
      %55 = vector.load %arg16[%c0_36, %c0_37] : memref<8x32xf32, #tpu.memory_space<vmem>>, vector<8x32xf32>
      tpu.vector_store %arg16[%c0_36, %c0_37], %54 {strides = array<i32>} : memref<8x32xf32, #tpu.memory_space<vmem>>, vector<8x32xf32>,
      %cst_38 = arith.constant 0.000000e+00 : f32
      %56 = vector.broadcast %cst_38 : f32 to vector<8x32xf32>
      %c0_39 = arith.constant 0 : index
      %c0_40 = arith.constant 0 : index
      %57 = vector.load %arg17[%c0_39, %c0_40] : memref<8x32xf32, #tpu.memory_space<vmem>>, vector<8x32xf32>
      tpu.vector_store %arg17[%c0_39, %c0_40], %56 {strides = array<i32>} : memref<8x32xf32, #tpu.memory_space<vmem>>, vector<8x32xf32>,
    } else {
    }
    %c0 = arith.constant 0 : index
    %c0_1 = arith.constant 0 : index
    %3 = vector.load %arg16[%c0, %c0_1] : memref<8x32xf32, #tpu.memory_space<vmem>>, vector<8x32xf32>
    %4 = arith.truncf %3 : vector<8x32xf32> to vector<8x32xbf16>
    %c0_2 = arith.constant 0 : index
    %c0_3 = arith.constant 0 : index
    %5 = vector.load %arg9[%c0_2, %c0_3] : memref<32x64xbf16, #tpu.memory_space<vmem>>, vector<32x64xbf16>
    %cst = arith.constant dense<0.000000e+00> : vector<8x64xf32>
    %6 = tpu.matmul %4, %5, %cst {dimension_numbers = #tpu.dot_dimension_numbers<[1], [0], [0], [1], [0, 0, 1, 1], [], []>} : vector<8x32xbf16>, vector<32x64xbf16>, vector<8x64xf32> -> vector<8x64xf32>
    %c0_4 = arith.constant 0 : index
    %c0_5 = arith.constant 0 : index
    %7 = vector.load %arg10[%c0_4, %c0_5] : memref<1x64xf32, #tpu.memory_space<vmem>>, vector<1x64xf32>
    %8 = vector.broadcast %7 : vector<1x64xf32> to vector<8x64xf32>
    %9 = arith.addf %6, %8 : vector<8x64xf32>
    %cst_6 = arith.constant 0.000000e+00 : f32
    %10 = vector.broadcast %cst_6 : f32 to vector<8x64xf32>
    %11 = arith.maximumf %9, %10 : vector<8x64xf32>
    %c0_7 = arith.constant 0 : index
    %c0_8 = arith.constant 0 : index
    %12 = vector.load %arg17[%c0_7, %c0_8] : memref<8x32xf32, #tpu.memory_space<vmem>>, vector<8x32xf32>
    %13 = arith.truncf %11 : vector<8x64xf32> to vector<8x64xbf16>
    %c0_9 = arith.constant 0 : index
    %c0_10 = arith.constant 0 : index
    %14 = vector.load %arg11[%c0_9, %c0_10] : memref<64x32xbf16, #tpu.memory_space<vmem>>, vector<64x32xbf16>
    %cst_11 = arith.constant dense<0.000000e+00> : vector<8x32xf32>
    %15 = tpu.matmul %13, %14, %cst_11 {dimension_numbers = #tpu.dot_dimension_numbers<[1], [0], [0], [1], [0, 0, 1, 1], [], []>} : vector<8x64xbf16>, vector<64x32xbf16>, vector<8x32xf32> -> vector<8x32xf32>
    %16 = arith.addf %12, %15 : vector<8x32xf32>
    %c0_12 = arith.constant 0 : index
    %c0_13 = arith.constant 0 : index
    %17 = vector.load %arg17[%c0_12, %c0_13] : memref<8x32xf32, #tpu.memory_space<vmem>>, vector<8x32xf32>
    tpu.vector_store %arg17[%c0_12, %c0_13], %16 {strides = array<i32>} : memref<8x32xf32, #tpu.memory_space<vmem>>, vector<8x32xf32>,
    %c0_i32_14 = arith.constant 0 : i32
    %18 = arith.cmpi eq, %arg2, %c0_i32_14 : i32
    %19 = arith.extui %18 : i1 to i32
    %c0_i32_15 = arith.constant 0 : i32
    %20 = arith.cmpi ne, %19, %c0_i32_15 : i32
    scf.if %20 {
      %c0_16 = arith.constant 0 : index
      %c0_17 = arith.constant 0 : index
      %21 = vector.load %arg16[%c0_16, %c0_17] : memref<8x32xf32, #tpu.memory_space<vmem>>, vector<8x32xf32>
      %c0_18 = arith.constant 0 : index
      %c0_19 = arith.constant 0 : index
      %22 = vector.load %arg17[%c0_18, %c0_19] : memref<8x32xf32, #tpu.memory_space<vmem>>, vector<8x32xf32>
      %23 = arith.addf %21, %22 : vector<8x32xf32>
      %c0_20 = arith.constant 0 : index
      %c0_21 = arith.constant 0 : index
      %24 = vector.load %arg12[%c0_20, %c0_21] : memref<1x32xf32, #tpu.memory_space<vmem>>, vector<1x32xf32>
      %25 = vector.broadcast %24 : vector<1x32xf32> to vector<8x32xf32>
      %26 = arith.addf %23, %25 : vector<8x32xf32>
      %c0_22 = arith.constant 0 : index
      %c0_23 = arith.constant 0 : index
      %27 = vector.load %arg13[%c0_22, %c0_23] : memref<1x32xf32, #tpu.memory_space<vmem>>, vector<1x32xf32>
      %c0_24 = arith.constant 0 : index
      %c0_25 = arith.constant 0 : index
      %28 = vector.load %arg14[%c0_24, %c0_25] : memref<1x32xf32, #tpu.memory_space<vmem>>, vector<1x32xf32>
      %cst_26 = arith.constant dense<0.000000e+00> : vector<8xf32>
      %29 = vector.multi_reduction <add>, %26, %cst_26 [1] : vector<8x32xf32> to vector<8xf32>
      %30 = vector.shape_cast %29 : vector<8xf32> to vector<8x1xf32>
      %cst_27 = arith.constant 3.200000e+01 : f32
      %31 = vector.broadcast %cst_27 : f32 to vector<8x1xf32>
      %32 = arith.divf %30, %31 : vector<8x1xf32>
      %33 = vector.broadcast %32 : vector<8x1xf32> to vector<8x32xf32>
      %34 = arith.subf %26, %33 : vector<8x32xf32>
      %35 = arith.mulf %34, %34 : vector<8x32xf32>
      %cst_28 = arith.constant dense<0.000000e+00> : vector<8xf32>
      %36 = vector.multi_reduction <add>, %35, %cst_28 [1] : vector<8x32xf32> to vector<8xf32>
      %37 = vector.shape_cast %36 : vector<8xf32> to vector<8x1xf32>
      %cst_29 = arith.constant 3.200000e+01 : f32
      %38 = vector.broadcast %cst_29 : f32 to vector<8x1xf32>
      %39 = arith.divf %37, %38 : vector<8x1xf32>
      %40 = vector.broadcast %32 : vector<8x1xf32> to vector<8x32xf32>
      %41 = arith.subf %26, %40 : vector<8x32xf32>
      %cst_30 = arith.constant 9.99999974E-6 : f32
      %42 = vector.broadcast %cst_30 : f32 to vector<8x1xf32>
      %43 = arith.addf %39, %42 : vector<8x1xf32>
      %44 = math.rsqrt %43 : vector<8x1xf32>
      %45 = vector.broadcast %44 : vector<8x1xf32> to vector<8x32xf32>
      %46 = arith.mulf %41, %45 : vector<8x32xf32>
      %47 = vector.broadcast %27 : vector<1x32xf32> to vector<8x32xf32>
      %48 = arith.mulf %46, %47 : vector<8x32xf32>
      %49 = vector.broadcast %28 : vector<1x32xf32> to vector<8x32xf32>
      %50 = arith.addf %48, %49 : vector<8x32xf32>
      %c0_31 = arith.constant 0 : index
      %c0_32 = arith.constant 0 : index
      %c0_33 = arith.constant 0 : index
      %51 = vector.load %arg15[%c0_31, %c0_32, %c0_33] : memref<1x8x32xf32, #tpu.memory_space<vmem>>, vector<1x8x32xf32>
      %52 = vector.shape_cast %51 : vector<1x8x32xf32> to vector<8x32xf32>
      %53 = vector.shape_cast %50 : vector<8x32xf32> to vector<1x8x32xf32>
      tpu.vector_store %arg15[%c0_31, %c0_32, %c0_33], %53 {strides = array<i32>} : memref<1x8x32xf32, #tpu.memory_space<vmem>>, vector<1x8x32xf32>,
    } else {
    }
    return
  }
  func.func @transform_0(%arg0: i32, %arg1: i32, %arg2: i32) -> (i32, i32, i32) {
    %c0_i32 = arith.constant 0 : i32
    %c0_i32_0 = arith.constant 0 : i32
    return %arg0, %arg1, %c0_i32 : i32, i32, i32
  }
  func.func @transform_1(%arg0: i32, %arg1: i32, %arg2: i32) -> (i32, i32, i32) {
    %c0_i32 = arith.constant 0 : i32
    %c0_i32_0 = arith.constant 0 : i32
    return %arg0, %arg1, %c0_i32 : i32, i32, i32
  }
  func.func @transform_2(%arg0: i32, %arg1: i32, %arg2: i32) -> (i32, i32) {
    %c0_i32 = arith.constant 0 : i32
    %c0_i32_0 = arith.constant 0 : i32
    %c0_i32_1 = arith.constant 0 : i32
    return %c0_i32, %c0_i32_0 : i32, i32
  }
  func.func @transform_3(%arg0: i32, %arg1: i32, %arg2: i32) -> (i32, i32) {
    %c0_i32 = arith.constant 0 : i32
    %c0_i32_0 = arith.constant 0 : i32
    %c0_i32_1 = arith.constant 0 : i32
    return %c0_i32, %c0_i32_0 : i32, i32
  }
  func.func @transform_4(%arg0: i32, %arg1: i32, %arg2: i32) -> (i32, i32) {
    %c0_i32 = arith.constant 0 : i32
    %c0_i32_0 = arith.constant 0 : i32
    %c0_i32_1 = arith.constant 0 : i32
    return %c0_i32, %c0_i32_0 : i32, i32
  }
  func.func @transform_5(%arg0: i32, %arg1: i32, %arg2: i32) -> (i32, i32) {
    %c0_i32 = arith.constant 0 : i32
    %c0_i32_0 = arith.constant 0 : i32
    %c0_i32_1 = arith.constant 0 : i32
    return %c0_i32, %c0_i32_0 : i32, i32
  }
  func.func @transform_6(%arg0: i32, %arg1: i32, %arg2: i32) -> (i32, i32) {
    %c0_i32 = arith.constant 0 : i32
    %c0_i32_0 = arith.constant 0 : i32
    return %c0_i32, %arg2 : i32, i32
  }
  func.func @transform_7(%arg0: i32, %arg1: i32, %arg2: i32) -> (i32, i32) {
    %c0_i32 = arith.constant 0 : i32
    %c0_i32_0 = arith.constant 0 : i32
    return %c0_i32, %arg2 : i32, i32
  }
  func.func @transform_8(%arg0: i32, %arg1: i32, %arg2: i32) -> (i32, i32) {
    %c0_i32 = arith.constant 0 : i32
    %c0_i32_0 = arith.constant 0 : i32
    return %arg2, %c0_i32 : i32, i32
  }
  func.func @transform_9(%arg0: i32, %arg1: i32, %arg2: i32) -> (i32, i32) {
    %c0_i32 = arith.constant 0 : i32
    %c0_i32_0 = arith.constant 0 : i32
    %c0_i32_1 = arith.constant 0 : i32
    return %c0_i32, %c0_i32_0 : i32, i32
  }
  func.func @transform_10(%arg0: i32, %arg1: i32, %arg2: i32) -> (i32, i32) {
    %c0_i32 = arith.constant 0 : i32
    %c0_i32_0 = arith.constant 0 : i32
    %c0_i32_1 = arith.constant 0 : i32
    return %c0_i32, %c0_i32_0 : i32, i32
  }
  func.func @transform_11(%arg0: i32, %arg1: i32, %arg2: i32) -> (i32, i32) {
    %c0_i32 = arith.constant 0 : i32
    %c0_i32_0 = arith.constant 0 : i32
    %c0_i32_1 = arith.constant 0 : i32
    return %c0_i32, %c0_i32_0 : i32, i32
  }
  func.func @transform_12(%arg0: i32, %arg1: i32, %arg2: i32) -> (i32, i32, i32) {
    %c0_i32 = arith.constant 0 : i32
    %c0_i32_0 = arith.constant 0 : i32
    return %arg0, %arg1, %c0_i32 : i32, i32, i32
  }
}

</mosaic_0001>

<bundles_post_ra>
// kernel: transformer_encoder_layer.3
= control target key start
LH: loop header
LB: loop body
LE: loop exit
PB: predicated region body
PF: predicated region fallthrough
CT: control target
= control target key end

     0   :  { %s442_s12 = smov 0   ;;  %s444_s13 = smov 0   ;;  %s484_s0 = inlined_call_operand.vmem [shape: f32[2,8,32], index: 0, kind: input, shape index: {}]   ;;  %s485_s1 = inlined_call_operand.vmem [shape: bf16[32,96], index: 1, kind: input, shape index: {}]   ;;  %s486_s2 = inlined_call_operand.vmem [shape: f32[1,96], index: 2, kind: input, shape index: {}]   ;;  %s487_s3 = inlined_call_operand.vmem [shape: bf16[2,8,96], index: 3, kind: output, shape index: {}]  }
   0x1   :  { %s446_s14 = smov 0  }
   0x2 LB: > { %s25_s15 = sadd.s32 1, %s414_s13  ;;  %p348_p0 = scmp.ge.s32.totalorder %s418_s14, 1  ;;  %s418_s14 = sphi %s446_s14, %s13_s14   ;;  %s414_s13 = sphi %s444_s13, %s489_s13   ;;  %s410_s12 = sphi %s442_s12, %s488_s12  }
   0x3   : > { %p27_p1 = scmp.ge.s32.totalorder %s25_s15, 2  ;;  %p155_p2 = scmp.lt.s32.totalorder %s418_s14, 3 }
   0x5   : > { %s491_s15 = smov (%p27_p1, %s25_s15), 0  ;;  %p156_p3 = pnand %p348_p0, %p155_p2 }
   0x6   : > { %v394_v0 = vld [vmem:[%s485_s1] sm:$0xff] (!%p156_p3)   ;;  %v420_v1 = vmov (!%p156_p3), 0.0   ;;  %v395_v2 = vld [vmem:[%s485_s1 + $0x8] sm:$0xff] (!%p156_p3)   ;;  %vm421_vm0 = vmmov (!%p156_p3), 0   ;;  %p183_p4 = scmp.lt.s32.totalorder (!%p156_p3), %s410_s12, 1  ;;  %vm223_vm1 = vcmask (!%p156_p3), 261120  }
   0x7   : > { %159 = sbr.rel (%p156_p3) target bundleno = 237 (0xed), region = 32  ;;  %360 = vmatprep.subr.bf16.mxu0 (!%p156_p3), %v420_v1  ;;  %364 = vmatprep.mubr.msk.bf16.mxu0 (!%p156_p3), %vm421_vm0, %v420_v1  ;;  %v351_v5 = vld [vmem:[%s486_s2] ss:$0 sm:$0xff] (!%p156_p3)  ;;  %vm268_vm2 = vcmask (!%p156_p3), 781312  }
   0x8   : > { %361 = vmatpush3.bf16.msra.mxu0 (!%p156_p3), %v394_v0 }
   0x9   : > { %362 = vmatprep.subr.bf16.mxu0 (!%p156_p3), %v420_v1 }
   0xc   : > { %363 = vmatpush3.bf16.msra.mxu0 (!%p156_p3), %v395_v2 }
   0xe   : > { %s493_s12 = smov (!%p183_p4, %s410_s12), 1 }
   0xf   : > { %s349_s20 = sshll.u32 %s493_s12, 3  ;;  %s350_s26 = sshll.u32 %s493_s12, 2 }
  0x10   : > { %s189_s23 = scalar_lea.vmem %s484_s0, %s349_s20  ;;  %s196_s29 = scalar_lea.vmem %s487_s3, %s350_s26 }
  0x11   : > { %v198_v3 = vld [vmem:[%s189_s23] sm:$0xff] }
  0x12   : > { %v199_v4 = vpack.c.bf16 %v198_v3, %v198_v3 }
  0x14   : > { %365 = vmatmul.mubr.msk.bf16.vlgmr.msra.gmra.mrb[0].mxu0 %vm223_vm1, %v199_v4 }
  0xe7   : > { %v261_v6 = vpop.f32.mrb[0].mxu0 }
  0xe8   : > { %v262_v7 = vadd.f32 %v351_v5, %v261_v6  ;;  %v366_v8 = vpop.f32.mrb[1].mxu0 }
  0xe9   : > { %v264_v9 = vpop.f32.mrb[2].mxu0 }
  0xea   : > { %v267_v10 = vpack.c.bf16 %v262_v7, %v262_v7  ;;  %v367_v11 = vpop.f32.mrb[3].mxu0 }
  0xec   : > { %269 = vst.msk [vmem:[%s196_s29] sm:$0xf] %vm268_vm2, %v267_v10 }
  0xed PF: > { %s13_s14 = sadd.s32 1, %s418_s14   ;;  %s488_s12 = smov %s414_s13 }
  0xee   : > { %p10_p5 = scmp.ge.s32.totalorder %s13_s14, 4   ;;  %s489_s13 = smov %s491_s15 }
  0xf0   :  { %12 = sbr.rel (!%p10_p5) target bundleno = 2 (0x2), region = 62 }

// kernel: transformer_encoder_layer.5
= control target key start
LH: loop header
LB: loop body
LE: loop exit
PB: predicated region body
PF: predicated region fallthrough
CT: control target
= control target key end

     0   :  { %s1441_s0 = inlined_call_operand.vmem [shape: bf16[2,8,32], index: 0, kind: input, shape index: {}]   ;;  %s1442_s1 = inlined_call_operand.vmem [shape: f32[2,8,32], index: 1, kind: input, shape index: {}]   ;;  %s1443_s2 = inlined_call_operand.vmem [shape: bf16[32,32], index: 2, kind: input, shape index: {}]   ;;  %s1444_s3 = inlined_call_operand.vmem [shape: f32[1,32], index: 3, kind: input, shape index: {}]   ;;  %s1445_s4 = inlined_call_operand.vmem [shape: f32[1,32], index: 4, kind: input, shape index: {}]   ;;  %s1446_s5 = inlined_call_operand.vmem [shape: f32[1,32], index: 5, kind: input, shape index: {}]   ;;  %s1447_s6 = inlined_call_operand.vmem [shape: bf16[32,64], index: 6, kind: input, shape index: {}]   ;;  %s1448_s7 = inlined_call_operand.vmem [shape: f32[1,64], index: 7, kind: input, shape index: {}]   ;;  %s1449_s8 = inlined_call_operand.vmem [shape: bf16[64,32], index: 8, kind: input, shape index: {}]   ;;  %s1450_s9 = inlined_call_operand.vmem [shape: f32[1,32], index: 9, kind: input, shape index: {}]   ;;  %s1451_s10 = inlined_call_operand.vmem [shape: f32[1,32], index: 10, kind: input, shape index: {}]   ;;  %s1452_s11 = inlined_call_operand.vmem [shape: f32[1,32], index: 11, kind: input, shape index: {}]   ;;  %s1453_s12 = inlined_call_operand.hbm [shape: f32[2,8,32], index: 12, kind: output, shape index: {}]  }
   0x1   :  { %1456 = sst [smem:[#allocation9_spill]] %s1441_s0 }
   0x2   :  { %1457 = sst [smem:[#allocation10_spill]] %s1443_s2 }
   0x3   :  { %17 = vsyncpa [#allocation5], 0 }
   0x4   :  { %19 = vsyncpa [#allocation5 + $0x1], 0  ;;  %s1259_s21 = smov 0   ;;  %s1261_s22 = smov 0  }
   0x5   :  { %s1263_s23 = smov 0   ;;  %s1265_s24 = smov 0  }
   0x6   :  { %s1267_s25 = smov 0   ;;  %s1269_s26 = smov 0  }
   0x7 LB: > { %1458 = sst [smem:[#allocation7_spill]] %s1185_s25  ;;  %s970_s27 = sadd.s32 4294967295, %s1189_s26   ;;  %s1189_s26 = sphi %s1269_s26, %s25_s26   ;;  %s1185_s25 = sphi %s1267_s25, %s1465_s25   ;;  %s1181_s24 = sphi %s1265_s24, %s1464_s24   ;;  %s1177_s23 = sphi %s1263_s23, %s1468_s23   ;;  %s1173_s22 = sphi %s1261_s22, %s1467_s22   ;;  %s1169_s21 = sphi %s1259_s21, %s1466_s21  }
   0x8   : > { %s971_s28 = sadd.s32 4294967294, %s1189_s26   ;;  %s44_s29 = sadd.s32 1, %s1185_s25 }
   0x9   : > { %s334_s30 = sadd.s32 1, %s1177_s23  ;;  %p46_p0 = scmp.ge.s32.totalorder %s44_s29, 2 }
   0xa   : > { %p344_p1 = scmp.ne.s32.totalorder %s1177_s23, %s1173_s22  ;;  %p345_p2 = scmp.eq.s32.totalorder %s970_s27, 1 }
   0xb   : > { %p350_p3 = scmp.ne.s32.totalorder %s1173_s22, %s1169_s21  ;;  %s1470_s29 = smov (%p46_p0, %s44_s29), 0 }
   0xc   : > { %1459 = sst [smem:[#allocation8_spill]] %s1470_s29  ;;  %p1299_p4 = por %p345_p2, %p344_p1 }
   0xd   : > { %p351_p5 = scmp.eq.s32.totalorder %s971_s28, 1  ;;  %s329_s14 = ssub.s32 %s1185_s25, %s1470_s29 }
   0xe   : > { %p977_p6 = scmp.ge.s32.totalorder %s1189_s26, 1  ;;  %p332_p7 = scmp.eq.s32.totalorder %s329_s14, 0 }
   0xf   : > { %p1306_p8 = por %p351_p5, %p350_p3  ;;  %p432_p9 = scmp.lt.s32.totalorder %s1189_s26, 3 }
  0x10   : > { %s1312_s16 = scalar_select %p332_p7, %s1177_s23, %s334_s30  }
  0x11   : > { %p433_p10 = pnand %p977_p6, %p432_p9 }
  0x12   : > { %s1462_s2 = sld [smem:[#allocation10_spill]] (!%p433_p10)  ;;  %v1191_v1 = vmov (!%p433_p10), 0.0   ;;  %vm1192_vm0 = vmmov (!%p433_p10), 0   ;;  %p495_p11 = scmp.lt.s32.totalorder (!%p433_p10), %s1181_s24, 1  ;;  %vm551_vm1 = vcmask (!%p433_p10), 261120   ;;  %v1101_v18 = vld [vmem:[%s1447_s6] sm:$0xff] (!%p433_p10)  }
  0x13   : > { %436 = sbr.rel (%p433_p10) target bundleno = 1342 (0x53e), region = 68  ;;  %1014 = vmatprep.subr.bf16.mxu1 (!%p433_p10), %v1191_v1  ;;  %1030 = vmatprep.subr.bf16.mxu0 (!%p433_p10), %v1191_v1  ;;  %628 = vst.msk [vmem:[#allocation3] sm:$0xff] (!%p433_p10), %vm551_vm1, %v1191_v1  ;;  %s1463_s0 = sld [smem:[#allocation9_spill]] (!%p433_p10)  ;;  %v981_v4 = vld [vmem:[%s1444_s3] ss:$0 sm:$0xff] (!%p433_p10)  ;;  %v1102_v19 = vld [vmem:[%s1447_s6 + $0x8] sm:$0xff] (!%p433_p10)  }
  0x14   : > { %1018 = vmatprep.mubr.msk.bf16.mxu1 (!%p433_p10), %vm1192_vm0, %v1191_v1  ;;  %1038 = vmatprep.mubr.msk.bf16.mxu0 (!%p433_p10), %vm1192_vm0, %v1191_v1  ;;  %v1103_v20 = vld [vmem:[%s1449_s8] sm:$0xff] (!%p433_p10)   ;;  %v1104_v21 = vld [vmem:[%s1449_s8 + $0x8] sm:$0xff] (!%p433_p10)   ;;  %v1105_v33 = vld [vmem:[%s1449_s8 + $0x10] sm:$0xff] (!%p433_p10)   ;;  %vm733_vm2 = vcmask (!%p433_p10), 523264   ;;  %s492_s19 = sand.u32 (!%p433_p10), 1, %s1173_s22  }
  0x15   : > { %1031 = vmatpush3.bf16.msra.mxu0 (!%p433_p10), %v1103_v20  ;;  %v985_v26 = vld [vmem:[%s1445_s4] ss:$0 sm:$0xff] (!%p433_p10)  ;;  %v1106_v34 = vld [vmem:[%s1449_s8 + $0x18] sm:$0xff] (!%p433_p10)   ;;  %s978_s20 = sshll.u32 (!%p433_p10), %s492_s19, 3 }
  0x16   : > { %1032 = vmatprep.subr.bf16.mxu0 (!%p433_p10), %v1191_v1  ;;  %v986_v28 = vld [vmem:[%s1446_s5] ss:$0 sm:$0xff] (!%p433_p10)  ;;  %s494_s30 = scalar_lea.vmem (!%p433_p10), [#allocation4], %s978_s20 }
  0x17   : > { %v987_v35 = vld [vmem:[%s1448_s7] ss:$0 sm:$0xff] (!%p433_p10)  ;;  %s839_s14 = sshll.u32 (!%p433_p10), %s494_s30, 4  ;;  %s1395_s14 = int_to_ptr.vmem [resolvable:$true] %s839_s14 }
  0x18   : > { %v1099_v0 = vld [vmem:[%s1462_s2] sm:$0xff] (!%p433_p10)   ;;  %v1100_v2 = vld [vmem:[%s1462_s2 + $0x8] sm:$0xff] (!%p433_p10)   ;;  %s1111_s25 = scalar_lea.vmem (!%p433_p10), %s1395_s14, 128 }
  0x19   : > { %1015 = vmatpush3.bf16.msra.mxu1 (!%p433_p10), %v1099_v0  ;;  %1033 = vmatpush3.bf16.msra.mxu0 (!%p433_p10), %v1104_v21  ;;  %v996_v50 = vld [vmem:[%s1450_s9] ss:$0 sm:$0xff] (!%p433_p10)  ;;  %p1112_p12 = scmp.ne.s32.totalorder (!%p433_p10), %s1395_s14, %s1111_s25 }
  0x1a   : > { %1016 = vmatprep.subr.bf16.mxu1 %v1191_v1  ;;  %s496_s27 = scalar_select %p495_p11, %s1181_s24, 1  ;;  %1034 = vmatprep.subr.bf16.mxu0 %v1191_v1  ;;  %v699_v43 = vld [vmem:[#allocation3] sm:$0xff]  ;;  %v997_v63 = vld [vmem:[%s1451_s10] ss:$0 sm:$0xff] }
  0x1b   : > { %p1113_p13 = pnand %p1112_p12, %p1299_p4 }
  0x1c   : > { %s979_s28 = sshll.u32 %s496_s27, 2  ;;  %s980_s18 = sshll.u32 %s496_s27, 3 }
  0x1d   : > { %1017 = vmatpush3.bf16.msra.mxu1 %v1100_v2  ;;  %s501_s17 = scalar_lea.vmem %s1463_s0, %s979_s28  ;;  %s508_s2 = scalar_lea.vmem %s1442_s1, %s980_s18  ;;  %1035 = vmatpush3.bf16.msra.mxu0 %v1105_v33 }
  0x1e   : > { %1022 = vmatprep.subr.bf16.mxu1 %v1191_v1  ;;  %v527_v3 = vld [vmem:[%s501_s17] sm:$0xf]  ;;  %1036 = vmatprep.subr.bf16.mxu0 %v1191_v1  ;;  %s1000_s28 = sshll.u32 %s1181_s24, 7  ;;  %s825_s27 = scalar_lea.sflag [#allocation5], %s492_s19 }
  0x1f   : > { %v595_v6 = vld [vmem:[%s508_s2] sm:$0xff]  ;;  %s1393_s0 = scalar_lea.hbm %s1453_s12, %s1000_s28  ;;  %p1114_p0 = pneg %p1113_p13 }
  0x20   : > { %1019 = vmatmul.mubr.msk.bf16.vlgmr.msra.gmra.mrb[0].mxu1 %vm551_vm1, %v527_v3  ;;  %s1193_s24 = smov [#allocation4]  }
  0x21   : > { %1026 = vmatprep.mubr.msk.bf16.mxu1 %vm1192_vm0, %v1191_v1  ;;  %1023 = vmatpush3.bf16.msra.mxu1 %v1101_v18  ;;  %s1115_s20 = sshll.u32 %s1193_s24, 4  ;;  %s1116_s20 = int_to_ptr.vmem [resolvable:$false] %s1115_s20 }
  0x22   : > { %1024 = vmatprep.subr.bf16.mxu1 %v1191_v1  ;;  %1037 = vmatpush3.bf16.msra.mxu0 %v1106_v34  ;;  %v998_v1 = vld [vmem:[%s1452_s11] ss:$0 sm:$0xff]  ;;  %s1117_s2 = scalar_lea.vmem %s1116_s20, 256  ;;  %p1118_p1 = scmp.lt.s32.totalorder %s1395_s14, %s1116_s20 }
  0x23   : > { %p1119_p2 = scmp.lt.s32.totalorder %s1117_s2, %s1111_s25 }
  0x25   : > { %1025 = vmatpush3.bf16.msra.mxu1 %v1102_v19  ;;  %p1120_p3 = por %p1119_p2, %p1118_p1 }
  0x27   : > { %p1121_p5 = pnand %p1120_p3, %p1114_p0 }
  0xf3   : > { %v589_v5 = vpop.f32.mrb[0].mxu1 }
  0xf4   : > { %v590_v7 = vadd.f32 %v981_v4, %v589_v5  ;;  %v1020_v8 = vpop.f32.mrb[1].mxu1 }
  0xf5   : > { %v592_v9 = vpop.f32.mrb[2].mxu1 }
  0xf6   : > { %v1021_v10 = vpop.f32.mrb[3].mxu1  ;;  %v596_v11 = vadd.f32 %v595_v6, %v590_v7 }
  0xf8   : > { %v599_v12 = vsel %vm551_vm1, %v596_v11, 0.0 }
  0xf9   : > { %600 = vadd.xlane.f32.xlu0 %v599_v12 }
 0x186   : > { %v601_v13 = vpop.xlane.xlu0 %600 }
 0x187   : > { %v603_v14 = vmul.f32 0.03125, %v601_v13 }
 0x189   : > { %v604_v15 = vsub.f32 %v596_v11, %v603_v14 }
 0x18b   : > { %v605_v16 = vmul.f32 %v604_v15, %v604_v15 }
 0x18d   : > { %v606_v17 = vsel %vm551_vm1, %v605_v16, 0.0 }
 0x18e   : > { %607 = vadd.xlane.f32.xlu0 %v606_v17 }
 0x21b   : > { %v608_v22 = vpop.xlane.xlu0 %607 }
 0x21c   : > { %v609_v23 = vmul.f32 0.03125, %v608_v22 }
 0x21e   : > { %v610_v24 = vadd.f32 1e-05, %v609_v23 }
 0x220   : > { %1107 = vrsqrt.f32 %v610_v24 }
 0x22a   : > { %v1108_v25 = vpop.eup %1107 }
 0x22b   : > { %v612_v27 = vmul.f32 %v1108_v25, %v604_v15 }
 0x22d   : > { %v619_v29 = vmul.f32 %v985_v26, %v612_v27 }
 0x22f   : > { %v626_v30 = vadd.f32 %v986_v28, %v619_v29 }
 0x231   : > { %627 = vst.msk [vmem:[#allocation2] sm:$0xff] %vm551_vm1, %v626_v30 }
 0x238   : > { %v629_v31 = vld [vmem:[#allocation2] sm:$0xff] }
 0x239   : > { %v630_v32 = vpack.c.bf16 %v629_v31, %v629_v31 }
 0x23b   : > { %1027 = vmatmul.mubr.msk.bf16.vlgmr.msra.gmra.mrb[4].mxu1 %vm551_vm1, %v630_v32 }
 0x30e   : > { %v692_v36 = vpop.f32.mrb[4].mxu1 }
 0x30f   : > { %v693_v37 = vadd.f32 %v987_v35, %v692_v36  ;;  %v1028_v38 = vpop.f32.mrb[5].mxu1 }
 0x310   : > { %v695_v39 = vpop.f32.mrb[6].mxu1 }
 0x311   : > { %v698_v40 = vmax.f32 %v693_v37, 0.0  ;;  %v1029_v41 = vpop.f32.mrb[7].mxu1 }
 0x313   : > { %v700_v42 = vpack.c.bf16 %v698_v40, %v698_v40 }
 0x315   : > { %1039 = vmatmul.mubr.msk.bf16.vlgmr.msra.gmra.mrb[0].mxu0 %vm733_vm2, %v700_v42 }
 0x3e8   : > { %v771_v44 = vpop.f32.mrb[0].mxu0 }
 0x3e9   : > { %v777_v45 = vadd.f32 %v771_v44, %v699_v43  ;;  %v1040_v46 = vpop.f32.mrb[1].mxu0 }
 0x3ea   : > { %v774_v47 = vpop.f32.mrb[2].mxu0 }
 0x3eb   : > { %778 = vst.msk [vmem:[#allocation3] sm:$0xff] %vm551_vm1, %v777_v45  ;;  %v1041_v48 = vpop.f32.mrb[3].mxu0 }
 0x3f2   : > { %v783_v49 = vld [vmem:[#allocation3] sm:$0xff] }
 0x3f3   : > { %v784_v51 = vadd.f32 %v783_v49, %v629_v31 }
 0x3f5   : > { %v792_v52 = vadd.f32 %v996_v50, %v784_v51 }
 0x3f7   : > { %v795_v53 = vsel %vm551_vm1, %v792_v52, 0.0 }
 0x3f8   : > { %796 = vadd.xlane.f32.xlu1 %v795_v53 }
 0x485   : > { %v797_v54 = vpop.xlane.xlu1 %796 }
 0x486   : > { %v799_v55 = vmul.f32 0.03125, %v797_v54 }
 0x488   : > { %v800_v56 = vsub.f32 %v792_v52, %v799_v55 }
 0x48a   : > { %v801_v57 = vmul.f32 %v800_v56, %v800_v56 }
 0x48c   : > { %v802_v58 = vsel %vm551_vm1, %v801_v57, 0.0 }
 0x48d   : > { %803 = vadd.xlane.f32.xlu1 %v802_v58 }
 0x51a   : > { %v804_v59 = vpop.xlane.xlu1 %803 }
 0x51b   : > { %v805_v60 = vmul.f32 0.03125, %v804_v59 }
 0x51d   : > { %v806_v61 = vadd.f32 1e-05, %v805_v60 }
 0x51f   : > { %1109 = vrsqrt.f32 %v806_v61 }
 0x529   : > { %v1110_v62 = vpop.eup %1109 }
 0x52a   : > { %v808_v0 = vmul.f32 %v1110_v62, %v800_v56 }
 0x52c   : > { %v815_v2 = vmul.f32 %v997_v63, %v808_v0 }
 0x52e   : > { %v822_v3 = vadd.f32 %v998_v1, %v815_v2 }
 0x530   : > { %823 = vst.msk [vmem:[%s494_s30] sm:$0xff] %vm551_vm1, %v822_v3 }
 0x531   : > { %1124 = shalt.err (!%p1121_p5)
}
 0x532   : > { %s1125_s19 = scalar_lea.hbm %s1393_s0, 128  ;;  %s1129_s30 = scalar_lea.hbm %s1453_s12, 256 }
 0x533   : > { %p1126_p6 = scmp.ne.s32.totalorder %s1393_s0, %s1125_s19  ;;  %p1130_p10 = scmp.lt.u32.totalorder %s1393_s0, %s1453_s12 }
 0x534   : > { %p1131_p11 = scmp.lt.u32.totalorder %s1129_s30, %s1125_s19  ;;  %p1133_p13 = scmp.lt.u32.totalorder %s1125_s19, %s1393_s0 }
 0x535   : > { %p1127_p7 = pnand %p1126_p6, %p1299_p4 }
 0x536   : > { %p1132_p12 = por %p1131_p11, %p1130_p10 }
 0x537   : > { %p1128_p9 = pneg %p1127_p7 }
 0x538   : > { %p1134_p0 = por %p1133_p13, %p1132_p12 }
 0x53a   : > { %p1135_p1 = pnand %p1134_p0, %p1128_p9 }
 0x53c   : > { %1138 = shalt.err (!%p1135_p1)
}
 0x53d   : > { %1042 = dma.vmem_to_hbm [thread:$0]  (%p1299_p4), %s1395_s14, 128, %s1393_s0, %s825_s27  }
 0x53e PF: > { %p1048_p2 = scmp.ge.s32.totalorder %s1189_s26, 2  ;;  %s851_s25 = sand.u32 1, %s1169_s21  }
 0x53f   : > { %s852_s24 = scalar_lea.sflag [#allocation5], %s851_s25 }
 0x540   : > { %p1045_p3 = pnand %p1048_p2, %p1306_p8 }
 0x542   : > { %1164 = dma.done.wait (!%p1045_p3), %s852_s24, 128  }
 0x543   : > { %1166 = vsyncadd (!%p1045_p3), %s852_s24, 4294967168  ;;  %s25_s26 = sadd.s32 1, %s1189_s26   ;;  %s1464_s24 = sld [smem:[#allocation7_spill]] }
 0x544   : > { %p22_p5 = scmp.ge.s32.totalorder %s25_s26, 4   ;;  %s1465_s25 = sld [smem:[#allocation8_spill]] }
 0x545   : > { %s1466_s21 = smov %s1173_s22  ;;  %s1467_s22 = smov %s1177_s23 }
 0x546   : > { %s1468_s23 = smov %s1312_s16  ;;  %24 = sbr.rel (!%p22_p5) target bundleno = 7 (0x7), region = 123 }
 0x54d   :  { %857 = vsyncpa [#allocation5], 1 }
 0x54e   :  { %859 = vsyncpa [#allocation5 + $0x1], 1 }

// kernel: transformer_encoder_layer.4
= control target key start
LH: loop header
LB: loop body
LE: loop exit
PB: predicated region body
PF: predicated region fallthrough
CT: control target
= control target key end

     0   :  { %s1176_s12 = smov 0   ;;  %s1178_s13 = smov 0   ;;  %s1362_s0 = inlined_call_operand.vmem [shape: bf16[2,4,8,8], index: 0, kind: input, shape index: {}]   ;;  %s1363_s1 = inlined_call_operand.vmem [shape: bf16[2,4,8,8], index: 1, kind: input, shape index: {}]   ;;  %s1364_s2 = inlined_call_operand.vmem [shape: bf16[2,4,8,8], index: 2, kind: input, shape index: {}]   ;;  %s1365_s3 = inlined_call_operand.vmem [shape: bf16[2,4,8,8], index: 3, kind: output, shape index: {}]  }
   0x1   :  { %s1180_s14 = smov 0  }
   0x2 LB: > { %s32_s15 = sadd.s32 1, %s1146_s13  ;;  %p987_p0 = scmp.ge.s32.totalorder %s1150_s14, 1  ;;  %s1150_s14 = sphi %s1180_s14, %s13_s14   ;;  %s1146_s13 = sphi %s1178_s13, %s1367_s13   ;;  %s1142_s12 = sphi %s1176_s12, %s1366_s12  }
   0x3   : > { %p34_p1 = scmp.ge.s32.totalorder %s32_s15, 2  ;;  %p193_p2 = scmp.lt.s32.totalorder %s1150_s14, 3 }
   0x5   : > { %s1369_s15 = smov (%p34_p1, %s32_s15), 0  ;;  %p194_p3 = pnand %p987_p0, %p193_p2 }
   0x6   : > { %p239_p4 = scmp.lt.s32.totalorder (!%p194_p3), %s1142_s12, 1  ;;  %vm285_vm0 = vcmask (!%p194_p3), 64512   ;;  %v1152_v0 = vmov (!%p194_p3), 0.0   ;;  %vm1153_vm1 = vmmov (!%p194_p3), 0   ;;  %vm276_vm2 = vcmask (!%p194_p3), 7168  }
   0x7   : > { %197 = sbr.rel (%p194_p3) target bundleno = 837 (0x345), region = 32  ;;  %1026 = vmatprep.subr.bf16.mxu0 (!%p194_p3), %v1152_v0  ;;  %286 = vst.msk [vmem:[#allocation4] sm:$0xff] (!%p194_p3), %vm285_vm0, %v1152_v0  ;;  %287 = vst.msk [vmem:[#allocation4 + $0x8] sm:$0xff] (!%p194_p3), %vm285_vm0, %v1152_v0  ;;  %1032 = vmatprep.subr.bf16.mxu1 (!%p194_p3), %v1152_v0  ;;  %v1154_v13 = vmov (!%p194_p3), -inf   ;;  %v1155_v38 = vmov (!%p194_p3), 0   ;;  %vm619_vm3 = vcmask (!%p194_p3), 1043456  }
   0x8   : > { %288 = vst.msk [vmem:[#allocation4 + $0x10] sm:$0xff] (!%p194_p3), %vm285_vm0, %v1152_v0  ;;  %289 = vst.msk [vmem:[#allocation4 + $0x18] sm:$0xff] (!%p194_p3), %vm285_vm0, %v1152_v0  ;;  %1028 = vmatprep.mubr.msk.bf16.mxu0 (!%p194_p3), %vm1153_vm1, %v1152_v0  ;;  %1034 = vmatprep.mubr.msk.bf16.mxu1 (!%p194_p3), %vm1153_vm1, %v1152_v0  ;;  %vm856_vm4 = vcmask (!%p194_p3), 60416  }
   0x9   : > { %277 = vst.msk [vmem:[#allocation2] sm:$0xff] (!%p194_p3), %vm276_vm2, %v1154_v13  ;;  %278 = vst.msk [vmem:[#allocation2 + $0x8] sm:$0xff] (!%p194_p3), %vm276_vm2, %v1154_v13  ;;  %1102 = vset.pattern.permute.xlu0 (!%p194_p3), %v1155_v38  ;;  %1103 = vset.pattern.permute.xlu1 (!%p194_p3), %v1155_v38 }
   0xa   : > { %279 = vst.msk [vmem:[#allocation2 + $0x10] sm:$0xff] (!%p194_p3), %vm276_vm2, %v1154_v13  ;;  %280 = vst.msk [vmem:[#allocation2 + $0x18] sm:$0xff] (!%p194_p3), %vm276_vm2, %v1154_v13 }
   0xb   : > { %281 = vst.msk [vmem:[#allocation3] sm:$0xff] (!%p194_p3), %vm276_vm2, %v1152_v0  ;;  %282 = vst.msk [vmem:[#allocation3 + $0x8] sm:$0xff] (!%p194_p3), %vm276_vm2, %v1152_v0 }
   0xc   : > { %283 = vst.msk [vmem:[#allocation3 + $0x10] sm:$0xff] (!%p194_p3), %vm276_vm2, %v1152_v0  ;;  %284 = vst.msk [vmem:[#allocation3 + $0x18] sm:$0xff] (!%p194_p3), %vm276_vm2, %v1152_v0 }
   0xe   : > { %s1371_s12 = smov (!%p239_p4, %s1142_s12), 1 }
   0xf   : > { %s1208_s16 = sshll.u32 %s1371_s12, 4 }
  0x10   : > { %s254_s19 = scalar_lea.vmem %s1363_s1, %s1208_s16  ;;  %s246_s22 = scalar_lea.vmem %s1362_s0, %s1208_s16  ;;  %v1266_v39 = vld [vmem:[#allocation2] sm:$0xff]  ;;  %v1271_v42 = vld [vmem:[#allocation2 + $0x8] sm:$0xff] }
  0x11   : > { %v294_v1 = vld [vmem:[%s254_s19] sm:$0xf]  ;;  %v295_v2 = vld [vmem:[%s254_s19 + $0x4] sm:$0xf]  ;;  %v296_v5 = vld [vmem:[%s254_s19 + $0x8] sm:$0xf]  ;;  %s262_s25 = scalar_lea.vmem %s1364_s2, %s1208_s16  ;;  %s270_s28 = scalar_lea.vmem %s1365_s3, %s1208_s16 }
  0x12   : > { %v307_v3 = vsel %vm285_vm0, %v294_v1, 0  ;;  %v353_v4 = vsel %vm285_vm0, %v295_v2, 0  ;;  %v297_v6 = vld [vmem:[%s254_s19 + $0xc] sm:$0xf]  ;;  %v290_v7 = vld [vmem:[%s246_s22] sm:$0xf] }
  0x13   : > { %1027 = vmatpush3.bf16.xpose.msra.mxu0 %v307_v3  ;;  %1033 = vmatpush3.bf16.xpose.msra.mxu1 %v353_v4  ;;  %v291_v8 = vld [vmem:[%s246_s22 + $0x4] sm:$0xf]  ;;  %v399_v9 = vsel %vm285_vm0, %v296_v5, 0  ;;  %v445_v10 = vsel %vm285_vm0, %v297_v6, 0  ;;  %v292_v11 = vld [vmem:[%s246_s22 + $0x8] sm:$0xf] }
  0x14   : > { %1038 = vmatprep.subr.bf16.mxu0 %v1152_v0  ;;  %1044 = vmatprep.subr.bf16.mxu1 %v1152_v0  ;;  %v293_v12 = vld [vmem:[%s246_s22 + $0xc] sm:$0xf]  ;;  %v1281_v46 = vld [vmem:[#allocation2 + $0x10] sm:$0xff]  ;;  %v1291_v50 = vld [vmem:[#allocation2 + $0x18] sm:$0xff] }
  0x15   : > { %v298_v55 = vld [vmem:[%s262_s25] sm:$0xf]  ;;  %v299_v57 = vld [vmem:[%s262_s25 + $0x4] sm:$0xf]  ;;  %v300_v59 = vld [vmem:[%s262_s25 + $0x8] sm:$0xf] }
  0x16   : > { %v621_v56 = vsel %vm619_vm3, %v298_v55, 0  ;;  %v667_v58 = vsel %vm619_vm3, %v299_v57, 0  ;;  %v713_v60 = vsel %vm619_vm3, %v300_v59, 0  ;;  %v301_v61 = vld [vmem:[%s262_s25 + $0xc] sm:$0xf]  ;;  %v557_v38 = vld [vmem:[#allocation3 + $0x10] sm:$0xff] }
  0x17   : > { %v759_v62 = vsel %vm619_vm3, %v301_v61, 0  ;;  %v584_v55 = vld [vmem:[#allocation4] sm:$0xff] }
  0x1a   : > { %1029 = vmatmul.mubr.msk.bf16.vlgmr.msra.gmra.mrb[0].mxu0 %vm285_vm0, %v290_v7  ;;  %1035 = vmatmul.mubr.msk.bf16.vlgmr.msra.gmra.mrb[0].mxu1 %vm285_vm0, %v291_v8 }
  0x1b   : > { %1039 = vmatpush3.bf16.xpose.msra.mxu0 %v399_v9  ;;  %1045 = vmatpush3.bf16.xpose.msra.mxu1 %v445_v10 }
  0x1c   : > { %1040 = vmatprep.mubr.msk.bf16.mxu0 %vm1153_vm1, %v1152_v0  ;;  %1046 = vmatprep.mubr.msk.bf16.mxu1 %vm1153_vm1, %v1152_v0 }
  0x1d   : > { %1050 = vmatprep.subr.bf16.mxu0 %v1152_v0  ;;  %1056 = vmatprep.subr.bf16.mxu1 %v1152_v0 }
  0x22   : > { %1041 = vmatmul.mubr.msk.bf16.vlgmr.msra.gmra.mrb[4].mxu0 %vm285_vm0, %v292_v11  ;;  %1047 = vmatmul.mubr.msk.bf16.vlgmr.msra.gmra.mrb[4].mxu1 %vm285_vm0, %v293_v12 }
  0x23   : > { %1052 = vmatprep.mubr.msk.bf16.mxu0 %vm1153_vm1, %v1152_v0  ;;  %1058 = vmatprep.mubr.msk.bf16.mxu1 %vm1153_vm1, %v1152_v0 }
  0x24   : > { %1051 = vmatpush3.bf16.msra.mxu0 %v621_v56  ;;  %1057 = vmatpush3.bf16.msra.mxu1 %v667_v58  ;;  %v585_v58 = vld [vmem:[#allocation4 + $0x8] sm:$0xff] }
  0x25   : > { %1062 = vmatprep.subr.bf16.mxu0 %v1152_v0  ;;  %1068 = vmatprep.subr.bf16.mxu1 %v1152_v0 }
  0xed   : > { %v343_v14 = vpop.f32.mrb[0].mxu0  ;;  %v389_v15 = vpop.f32.mrb[0].mxu1 }
  0xee   : > { %v1250_v16 = vmul.f32 0.35355338, %v343_v14  ;;  %v1030_v17 = vpop.f32.mrb[1].mxu0  ;;  %v1252_v18 = vmul.f32 0.35355338, %v389_v15  ;;  %v1036_v19 = vpop.f32.mrb[1].mxu1 }
  0xef   : > { %v346_v20 = vpop.f32.mrb[2].mxu0  ;;  %v392_v21 = vpop.f32.mrb[2].mxu1 }
  0xf0   : > { %v1031_v22 = vpop.f32.mrb[3].mxu0  ;;  %v495_v23 = vsel %vm285_vm0, %v1250_v16, -inf  ;;  %v1037_v24 = vpop.f32.mrb[3].mxu1  ;;  %v498_v25 = vsel %vm285_vm0, %v1252_v18, -inf }
  0xf1   : > { %496 = vmax.xlane.f32.xlu0 %v495_v23 }
  0xf5   : > { %499 = vmax.xlane.f32.xlu0 %v498_v25  ;;  %v435_v26 = vpop.f32.mrb[4].mxu0  ;;  %v481_v27 = vpop.f32.mrb[4].mxu1 }
  0xf6   : > { %v1258_v28 = vmul.f32 0.35355338, %v435_v26  ;;  %v1042_v29 = vpop.f32.mrb[5].mxu0  ;;  %v1260_v30 = vmul.f32 0.35355338, %v481_v27  ;;  %v1048_v31 = vpop.f32.mrb[5].mxu1 }
  0xf7   : > { %v438_v32 = vpop.f32.mrb[6].mxu0  ;;  %v484_v33 = vpop.f32.mrb[6].mxu1  ;;  %v555_v31 = vld [vmem:[#allocation3] sm:$0xff] }
  0xf8   : > { %v1043_v34 = vpop.f32.mrb[7].mxu0  ;;  %v501_v35 = vsel %vm285_vm0, %v1258_v28, -inf  ;;  %v1049_v36 = vpop.f32.mrb[7].mxu1  ;;  %v504_v37 = vsel %vm285_vm0, %v1260_v30, -inf }
  0xf9   : > { %502 = vmax.xlane.f32.xlu1 %v501_v35  ;;  %v556_v34 = vld [vmem:[#allocation3 + $0x8] sm:$0xff] }
  0xfd   : > { %505 = vmax.xlane.f32.xlu1 %v504_v37 }
 0x17e   : > { %v497_v40 = vpop.xlane.xlu0 %496 }
 0x17f   : > { %v1269_v41 = vmax.f32 %v1266_v39, %v497_v40 }
 0x181   : > { %v511_v43 = vsub.f32 %v1266_v39, %v1269_v41  ;;  %809 = vst.msk [vmem:[#allocation2] sm:$0xff] %vm276_vm2, %v1269_v41  ;;  %525 = vperm.xlu0 %1102, %v1269_v41  }
 0x182   : > { %v500_v44 = vpop.xlane.xlu0 %499 }
 0x183   : > { %v1279_v45 = vmax.f32 %v1271_v42, %v500_v44 }
 0x185   : > { %v512_v47 = vsub.f32 %v1271_v42, %v1279_v45  ;;  %810 = vst.msk [vmem:[#allocation2 + $0x8] sm:$0xff] %vm276_vm2, %v1279_v45  ;;  %530 = vperm.xlu1 %1103, %v1279_v45   ;;  %v558_v42 = vld [vmem:[#allocation3 + $0x18] sm:$0xff] }
 0x186   : > { %v503_v48 = vpop.xlane.xlu1 %502 }
 0x187   : > { %v1289_v49 = vmax.f32 %v1281_v46, %v503_v48  ;;  %v517_v22 = vmul.f32 1.442695, %v512_v47 }
 0x189   : > { %v513_v51 = vsub.f32 %v1281_v46, %v1289_v49  ;;  %811 = vst.msk [vmem:[#allocation2 + $0x10] sm:$0xff] %vm276_vm2, %v1289_v49  ;;  %535 = vperm.xlu1 %1103, %v1289_v49  }
 0x18a   : > { %v506_v52 = vpop.xlane.xlu1 %505 }
 0x18b   : > { %v1299_v53 = vmax.f32 %v1291_v50, %v506_v52  ;;  %v519_v25 = vmul.f32 1.442695, %v513_v51 }
 0x18d   : > { %v514_v54 = vsub.f32 %v1291_v50, %v1299_v53  ;;  %812 = vst.msk [vmem:[#allocation2 + $0x18] sm:$0xff] %vm276_vm2, %v1299_v53  ;;  %540 = vperm.xlu1 %1103, %v1299_v53  }
 0x18f   : > { %v521_v26 = vmul.f32 1.442695, %v514_v54 }
 0x200   : > { %v526_v63 = vpop.permute.xlu0 %525 }
 0x201   : > { %v543_v1 = vsub.f32 %v1250_v16, %v526_v63 }
 0x203   : > { %v547_v2 = vmul.f32 1.442695, %v543_v1 }
 0x204   : > { %v531_v3 = vpop.permute.xlu1 %530 }
 0x205   : > { %1104 = vpow2.f32 %v547_v2  ;;  %v544_v4 = vsub.f32 %v1252_v18, %v531_v3 }
 0x207   : > { %v549_v5 = vmul.f32 1.442695, %v544_v4  ;;  %v586_v4 = vld [vmem:[#allocation4 + $0x10] sm:$0xff] }
 0x208   : > { %v536_v6 = vpop.permute.xlu1 %535 }
 0x209   : > { %1106 = vpow2.f32 %v549_v5  ;;  %v545_v7 = vsub.f32 %v1258_v28, %v536_v6 }
 0x20b   : > { %v551_v8 = vmul.f32 1.442695, %v545_v7 }
 0x20c   : > { %v541_v9 = vpop.permute.xlu1 %540 }
 0x20d   : > { %1108 = vpow2.f32 %v551_v8  ;;  %v546_v10 = vsub.f32 %v1260_v30, %v541_v9 }
 0x20f   : > { %v1105_v11 = vpop.eup %1104  ;;  %v553_v12 = vmul.f32 1.442695, %v546_v10 }
 0x210   : > { %v563_v13 = vsel %vm285_vm0, %v1105_v11, 0.0  ;;  %v612_v14 = vpack.c.bf16 %v1105_v11, %v1105_v11  ;;  %v587_v11 = vld [vmem:[#allocation4 + $0x18] sm:$0xff] }
 0x211   : > { %1110 = vpow2.f32 %v553_v12  ;;  %564 = vadd.xlane.f32.xlu1 %v563_v13 }
 0x212   : > { %1053 = vmatmul.mubr.msk.bf16.vlgmr.msra.gmra.mrb[8].mxu0 %vm285_vm0, %v612_v14  ;;  %1112 = vpow2.f32 %v517_v22 }
 0x213   : > { %v1107_v15 = vpop.eup %1106  ;;  %1063 = vmatpush3.bf16.msra.mxu0 %v713_v60  ;;  %1064 = vmatprep.mubr.msk.bf16.mxu0 %vm1153_vm1, %v1152_v0 }
 0x214   : > { %v566_v16 = vsel %vm285_vm0, %v1107_v15, 0.0  ;;  %v613_v17 = vpack.c.bf16 %v1107_v15, %v1107_v15 }
 0x215   : > { %567 = vadd.xlane.f32.xlu0 %v566_v16 }
 0x216   : > { %1059 = vmatmul.mubr.msk.bf16.vlgmr.msra.gmra.mrb[8].mxu1 %vm285_vm0, %v613_v17 }
 0x217   : > { %v1109_v18 = vpop.eup %1108  ;;  %1069 = vmatpush3.bf16.msra.mxu1 %v759_v62  ;;  %1070 = vmatprep.mubr.msk.bf16.mxu1 %vm1153_vm1, %v1152_v0  ;;  %v515_v0 = vmul.f32 1.442695, %v511_v43 }
 0x218   : > { %v569_v19 = vsel %vm285_vm0, %v1109_v18, 0.0  ;;  %v614_v20 = vpack.c.bf16 %v1109_v18, %v1109_v18 }
 0x219   : > { %570 = vadd.xlane.f32.xlu1 %v569_v19  ;;  %1114 = vpow2.f32 %v515_v0 }
 0x21a   : > { %1065 = vmatmul.mubr.msk.bf16.vlgmr.msra.gmra.mrb[12].mxu0 %vm285_vm0, %v614_v20  ;;  %1116 = vpow2.f32 %v519_v25 }
 0x21b   : > { %v1111_v21 = vpop.eup %1110  ;;  %1118 = vpow2.f32 %v521_v26 }
 0x21c   : > { %v572_v23 = vsel %vm285_vm0, %v1111_v21, 0.0  ;;  %v615_v24 = vpack.c.bf16 %v1111_v21, %v1111_v21  ;;  %v1113_v27 = vpop.eup %1112 }
 0x21d   : > { %573 = vadd.xlane.f32.xlu1 %v572_v23  ;;  %v560_v36 = vmul.f32 %v1113_v27, %v556_v34 }
 0x21e   : > { %1071 = vmatmul.mubr.msk.bf16.vlgmr.msra.gmra.mrb[12].mxu1 %vm285_vm0, %v615_v24 }
 0x223   : > { %v1115_v28 = vpop.eup %1114 }
 0x224   : > { %v1117_v29 = vpop.eup %1116  ;;  %v559_v32 = vmul.f32 %v1115_v28, %v555_v31 }
 0x225   : > { %v1119_v30 = vpop.eup %1118  ;;  %v561_v40 = vmul.f32 %v1117_v29, %v557_v38 }
 0x226   : > { %v562_v45 = vmul.f32 %v1119_v30, %v558_v42 }
 0x22b   : > { %595 = vperm.xlu0 %1102, %v1113_v27  }
 0x22e   : > { %590 = vperm.xlu1 %1103, %v1115_v28  }
 0x232   : > { %600 = vperm.xlu1 %1103, %v1117_v29  }
 0x236   : > { %605 = vperm.xlu1 %1103, %v1119_v30  }
 0x29e   : > { %v565_v33 = vpop.xlane.xlu1 %564 }
 0x29f   : > { %v575_v35 = vadd.f32 %v565_v33, %v559_v32 }
 0x2a1   : > { %580 = vst.msk [vmem:[#allocation3] sm:$0xff] %vm276_vm2, %v575_v35 }
 0x2a2   : > { %v568_v37 = vpop.xlane.xlu0 %567 }
 0x2a3   : > { %v576_v39 = vadd.f32 %v568_v37, %v560_v36 }
 0x2a5   : > { %581 = vst.msk [vmem:[#allocation3 + $0x8] sm:$0xff] %vm276_vm2, %v576_v39 }
 0x2a6   : > { %v571_v41 = vpop.xlane.xlu1 %570 }
 0x2a7   : > { %v577_v43 = vadd.f32 %v571_v41, %v561_v40 }
 0x2a8   : > { %v816_v44 = vld [vmem:[#allocation3] sm:$0xff] }
 0x2a9   : > { %582 = vst.msk [vmem:[#allocation3 + $0x10] sm:$0xff] %vm276_vm2, %v577_v43  ;;  %1120 = vrcp.f32 %v816_v44 }
 0x2aa   : > { %v574_v46 = vpop.xlane.xlu1 %573  ;;  %v596_v59 = vpop.permute.xlu0 %595 }
 0x2ab   : > { %v578_v47 = vadd.f32 %v574_v46, %v562_v45  ;;  %v609_v2 = vmul.f32 %v596_v59, %v585_v58 }
 0x2ac   : > { %v817_v48 = vld [vmem:[#allocation3 + $0x8] sm:$0xff] }
 0x2ad   : > { %583 = vst.msk [vmem:[#allocation3 + $0x18] sm:$0xff] %vm276_vm2, %v578_v47  ;;  %1122 = vrcp.f32 %v817_v48 }
 0x2ae   : > { %v591_v56 = vpop.permute.xlu1 %590 }
 0x2af   : > { %v608_v57 = vmul.f32 %v591_v56, %v584_v55 }
 0x2b0   : > { %v818_v49 = vld [vmem:[#allocation3 + $0x10] sm:$0xff] }
 0x2b1   : > { %1124 = vrcp.f32 %v818_v49 }
 0x2b2   : > { %v601_v63 = vpop.permute.xlu1 %600 }
 0x2b3   : > { %v1121_v50 = vpop.eup %1120  ;;  %v610_v9 = vmul.f32 %v601_v63, %v586_v4 }
 0x2b4   : > { %830 = vperm.xlu1 %1103, %v1121_v50   ;;  %v819_v51 = vld [vmem:[#allocation3 + $0x18] sm:$0xff] }
 0x2b5   : > { %1126 = vrcp.f32 %v819_v51 }
 0x2b6   : > { %v606_v12 = vpop.permute.xlu1 %605 }
 0x2b7   : > { %v1123_v52 = vpop.eup %1122  ;;  %v611_v17 = vmul.f32 %v606_v12, %v587_v11 }
 0x2b8   : > { %835 = vperm.xlu0 %1102, %v1123_v52  }
 0x2bb   : > { %v1125_v53 = vpop.eup %1124 }
 0x2bc   : > { %840 = vperm.xlu1 %1103, %v1125_v53  }
 0x2bf   : > { %v1127_v54 = vpop.eup %1126 }
 0x2c0   : > { %845 = vperm.xlu0 %1102, %v1127_v54  }
 0x2e5   : > { %v657_v60 = vpop.f32.mrb[8].mxu0 }
 0x2e6   : > { %v801_v61 = vadd.f32 %v657_v60, %v608_v57  ;;  %v1054_v62 = vpop.f32.mrb[9].mxu0 }
 0x2e7   : > { %v660_v1 = vpop.f32.mrb[10].mxu0 }
 0x2e8   : > { %805 = vst.msk [vmem:[#allocation4] sm:$0xff] %vm285_vm0, %v801_v61  ;;  %v1055_v3 = vpop.f32.mrb[11].mxu0 }
 0x2e9   : > { %v703_v5 = vpop.f32.mrb[8].mxu1 }
 0x2ea   : > { %v802_v6 = vadd.f32 %v703_v5, %v609_v2  ;;  %v1060_v7 = vpop.f32.mrb[9].mxu1 }
 0x2eb   : > { %v706_v8 = vpop.f32.mrb[10].mxu1 }
 0x2ec   : > { %806 = vst.msk [vmem:[#allocation4 + $0x8] sm:$0xff] %vm285_vm0, %v802_v6  ;;  %v1061_v10 = vpop.f32.mrb[11].mxu1 }
 0x2ed   : > { %v749_v13 = vpop.f32.mrb[12].mxu0 }
 0x2ee   : > { %v803_v14 = vadd.f32 %v749_v13, %v610_v9  ;;  %v1066_v15 = vpop.f32.mrb[13].mxu0 }
 0x2ef   : > { %v752_v16 = vpop.f32.mrb[14].mxu0  ;;  %v824_v0 = vld [vmem:[#allocation4] sm:$0xff] }
 0x2f0   : > { %807 = vst.msk [vmem:[#allocation4 + $0x10] sm:$0xff] %vm285_vm0, %v803_v14  ;;  %v1067_v18 = vpop.f32.mrb[15].mxu0 }
 0x2f1   : > { %v795_v19 = vpop.f32.mrb[12].mxu1 }
 0x2f2   : > { %v804_v20 = vadd.f32 %v795_v19, %v611_v17  ;;  %v1072_v21 = vpop.f32.mrb[13].mxu1 }
 0x2f3   : > { %v798_v22 = vpop.f32.mrb[14].mxu1  ;;  %v825_v27 = vld [vmem:[#allocation4 + $0x8] sm:$0xff] }
 0x2f4   : > { %808 = vst.msk [vmem:[#allocation4 + $0x18] sm:$0xff] %vm285_vm0, %v804_v20  ;;  %v1073_v23 = vpop.f32.mrb[15].mxu1 }
 0x2f7   : > { %v826_v32 = vld [vmem:[#allocation4 + $0x10] sm:$0xff] }
 0x2fb   : > { %v827_v36 = vld [vmem:[#allocation4 + $0x18] sm:$0xff] }
 0x333   : > { %v831_v24 = vpop.permute.xlu1 %830 }
 0x334   : > { %v848_v25 = vmul.f32 %v831_v24, %v824_v0 }
 0x336   : > { %v852_v26 = vpack.c.bf16 %v848_v25, %v848_v25 }
 0x337   : > { %v836_v28 = vpop.permute.xlu0 %835 }
 0x338   : > { %857 = vst.msk [vmem:[%s270_s28] sm:$0xf] %vm856_vm4, %v852_v26  ;;  %v849_v29 = vmul.f32 %v836_v28, %v825_v27 }
 0x33a   : > { %v853_v30 = vpack.c.bf16 %v849_v29, %v849_v29 }
 0x33b   : > { %v841_v31 = vpop.permute.xlu1 %840 }
 0x33c   : > { %858 = vst.msk [vmem:[%s270_s28 + $0x4] sm:$0xf] %vm856_vm4, %v853_v30  ;;  %v850_v33 = vmul.f32 %v841_v31, %v826_v32 }
 0x33e   : > { %v854_v34 = vpack.c.bf16 %v850_v33, %v850_v33 }
 0x33f   : > { %v846_v35 = vpop.permute.xlu0 %845 }
 0x340   : > { %859 = vst.msk [vmem:[%s270_s28 + $0x8] sm:$0xf] %vm856_vm4, %v854_v34  ;;  %v851_v37 = vmul.f32 %v846_v35, %v827_v36 }
 0x342   : > { %v855_v38 = vpack.c.bf16 %v851_v37, %v851_v37 }
 0x344   : > { %860 = vst.msk [vmem:[%s270_s28 + $0xc] sm:$0xf] %vm856_vm4, %v855_v38 }
 0x345 PF: > { %s13_s14 = sadd.s32 1, %s1150_s14   ;;  %s1366_s12 = smov %s1146_s13 }
 0x346   : > { %p10_p5 = scmp.ge.s32.totalorder %s13_s14, 4   ;;  %s1367_s13 = smov %s1369_s15 }
 0x348   :  { %12 = sbr.rel (!%p10_p5) target bundleno = 2 (0x2), region = 76 }

</bundles_post_ra>
